<compile_context>
chip_gen: v5e
topology: v5e:2x2
jax: 0.10.0
libtpu: 0.0.40
codegen_flags: <defaults>
</compile_context>

<pallas_src>
import functools

import jax
import jax.numpy as jnp
import numpy as np
from jax import lax
from jax.experimental import pallas as pl
from jax.experimental.pallas import tpu as pltpu


_SUBLANE = 8  # f32 sublane count: batch is padded to this for aligned per-step reads


def _lstm_kernel(x_ref, wih_ref, whh_ref, b_ref, out_ref, pre_ref,
                 *, T, B, B_pad, H):
    """Single-invocation LSTM: batched input projection + unrolled recurrence.

    x_ref   : (T*B_pad, D)  time-major rows (row = t*B_pad + b), zero-padded batch, f32
    wih_ref : (D, 4H)       gate columns in [i, f, o, g] order, f32
    whh_ref : (H, 4H)       gate columns in [i, f, o, g] order, f32
    b_ref   : (1, 4H)       f32, b_ih + b_hh
    out_ref : (B, H)        f32  -- hn[-1]
    pre_ref : (T*B_pad, 4H) f32 VMEM scratch: pre-activation input contributions
    """
    # ---- Phase 1: hoisted input projection -- ONE MXU matmul over all timesteps,
    #      bias folded in once (no per-step broadcast/add inside the recurrence).
    pre_ref[...] = (
        jnp.dot(x_ref[...], wih_ref[...], preferred_element_type=jnp.float32)
        + b_ref[...]
    )

    whh = whh_ref[...]   # (H, 4H): stays resident across the whole loop, f32 (no casts)
    # NOTE: holding W_hh in the MXU weight registers (pltpu.matmul_push_rhs /
    # matmul_acc_lhs / matmul_pop) would shave the per-step RHS push off the serial
    # chain; kept as plain jnp.dot for portability across v5e/v6e/v7x MXU tilings.

    # ---- Phase 2: sequential recurrence, fully unrolled (T is small and static) so
    #      the LLO scheduler can overlap step t's MXU push with step t-1's EUP/VPU
    #      gate math.  All slices start on sublane multiples (B_pad = 8).
    h = jnp.zeros((B_pad, H), jnp.float32)
    c = jnp.zeros((B_pad, H), jnp.float32)
    for t in range(T):
        gates = pre_ref[t * B_pad:(t + 1) * B_pad, :] + jnp.dot(
            h, whh, preferred_element_type=jnp.float32)            # (B_pad, 4H)
        # Gate layout is [i | f | o | g]: one sigmoid over the contiguous 3H slab,
        # one tanh over the trailing H columns.
        sig = jax.nn.sigmoid(gates[:, :3 * H])
        i_g = sig[:, 0 * H:1 * H]
        f_g = sig[:, 1 * H:2 * H]
        o_g = sig[:, 2 * H:3 * H]
        g_g = jnp.tanh(gates[:, 3 * H:])
        c = f_g * c + i_g * g_g
        h = o_g * jnp.tanh(c)

    # ---- Single HBM-visible write: only the last hidden state of the real rows.
    out_ref[...] = h[:B].astype(out_ref.dtype)


def _reorder_gates(w):
    """PyTorch packs gates [i, f, g, o] along the leading 4H axis; reorder to [i, f, o, g]."""
    i, f, g, o = jnp.split(w, 4, axis=0)
    return jnp.concatenate([i, f, o, g], axis=0)


def prepare_lstm_params(w_ih, w_hh, b_ih, b_hh):
    """One-time weight packing (call at module init, NOT per forward pass)."""
    wih_t = jnp.transpose(_reorder_gates(w_ih)).astype(jnp.float32)        # (D, 4H)
    whh_t = jnp.transpose(_reorder_gates(w_hh)).astype(jnp.float32)        # (H, 4H)
    bias = _reorder_gates(b_ih + b_hh).reshape(1, -1).astype(jnp.float32)  # (1, 4H)
    return wih_t, whh_t, bias


@jax.jit
def lstm_last_hidden(x, wih_t, whh_t, bias):
    """x: (B, T, D) batch_first (PyTorch convention); weights pre-packed via
    prepare_lstm_params.  Returns hn[-1]: (B, H) float32."""
    B, T, D = x.shape
    H = whh_t.shape[0]
    B_pad = max(_SUBLANE, ((B + _SUBLANE - 1) // _SUBLANE) * _SUBLANE)

    # Time-major + zero-pad batch to a sublane multiple so every per-step slab inside
    # the kernel is tile-aligned; padded rows are dropped inside the kernel.
    x_tm = jnp.transpose(x, (1, 0, 2)).astype(jnp.float32)          # (T, B, D)
    x_tm = jnp.pad(x_tm, ((0, 0), (0, B_pad - B), (0, 0)))          # (T, B_pad, D)
    x2d = x_tm.reshape(T * B_pad, D)

    kernel = functools.partial(_lstm_kernel, T=T, B=B, B_pad=B_pad, H=H)

    return pl.pallas_call(
        kernel,
        out_shape=jax.ShapeDtypeStruct((B, H), jnp.float32),
        # No grid: single kernel invocation, whole (small) arrays resident in VMEM,
        # no auto double-buffering of single-block inputs.
        in_specs=[
            pl.BlockSpec(memory_space=pltpu.MemorySpace.VMEM),
            pl.BlockSpec(memory_space=pltpu.MemorySpace.VMEM),
            pl.BlockSpec(memory_space=pltpu.MemorySpace.VMEM),
            pl.BlockSpec(memory_space=pltpu.MemorySpace.VMEM),
        ],
        out_specs=pl.BlockSpec(memory_space=pltpu.MemorySpace.VMEM),
        scratch_shapes=[
            pltpu.VMEM((T * B_pad, 4 * H), jnp.float32),   # pre-activation gates
        ],
        # TODO(synk): at production T/B, chunk the time axis (pltpu.emit_pipeline) so
        # the pre-gate scratch fits v7x's 64 MiB VMEM, and add a 'parallel' grid axis
        # over independent sequences to use v7x's second TensorCore.
    )(x2d, wih_t, whh_t, bias)


def _lstm_reference(x, w_ih, w_hh, b_ih, b_hh):
    """Pure-JAX f32 reference (same math as torch.nn.LSTM forward, 1 layer)."""
    B, T, D = x.shape
    H = w_hh.shape[1]
    wih_t = w_ih.T
    whh_t = w_hh.T
    b = b_ih + b_hh

    def step(carry, x_t):
        h, c = carry
        gates = x_t @ wih_t + h @ whh_t + b
        i = jax.nn.sigmoid(gates[:, 0 * H:1 * H])
        f = jax.nn.sigmoid(gates[:, 1 * H:2 * H])
        g = jnp.tanh(gates[:, 2 * H:3 * H])
        o = jax.nn.sigmoid(gates[:, 3 * H:4 * H])
        c = f * c + i * g
        h = o * jnp.tanh(c)
        return (h, c), None

    h0 = jnp.zeros((B, H), jnp.float32)
    c0 = jnp.zeros((B, H), jnp.float32)
    (h, _), _ = lax.scan(step, (h0, c0), jnp.transpose(x, (1, 0, 2)))
    return h


if __name__ == "__main__":
    # Module defaults: input_dim=300, hidden_dim=64, num_layers=1.
    B, T, D, H = 2, 8, 300, 64

    key = jax.random.PRNGKey(0)
    kx, k1, k2, k3, k4 = jax.random.split(key, 5)

    # Deterministic parameter init, same scheme as PyTorch: U(-1/sqrt(H), 1/sqrt(H)).
    bound = 1.0 / np.sqrt(H)
    x = jax.random.normal(kx, (B, T, D), dtype=jnp.float32)
    w_ih = jax.random.uniform(k1, (4 * H, D), jnp.float32, -bound, bound)
    w_hh = jax.random.uniform(k2, (4 * H, H), jnp.float32, -bound, bound)
    b_ih = jax.random.uniform(k3, (4 * H,), jnp.float32, -bound, bound)
    b_hh = jax.random.uniform(k4, (4 * H,), jnp.float32, -bound, bound)

    # One-time weight packing (corresponds to module __init__).
    wih_t, whh_t, bias = prepare_lstm_params(w_ih, w_hh, b_ih, b_hh)

    out = jax.block_until_ready(lstm_last_hidden(x, wih_t, whh_t, bias))

    ref = jax.block_until_ready(_lstm_reference(x, w_ih, w_hh, b_ih, b_hh))
    np.testing.assert_allclose(np.asarray(out), np.asarray(ref), rtol=1e-5, atol=1e-5)

    print("KERNEL_OK")
</pallas_src>

<mosaic_0001>
module attributes {stable_mosaic.version = 11 : i64} {
  func.func @_lstm_kernel(%arg0: memref<64x300xf32, #tpu.memory_space<vmem>>, %arg1: memref<300x256xf32, #tpu.memory_space<vmem>>, %arg2: memref<64x256xf32, #tpu.memory_space<vmem>>, %arg3: memref<1x256xf32, #tpu.memory_space<vmem>>, %arg4: memref<2x64xf32, #tpu.memory_space<vmem>>, %arg5: memref<64x256xf32, #tpu.memory_space<vmem>>) attributes {dimension_semantics = [], scalar_prefetch = 0 : i64, scratch_operands = 1 : i64, tpu.core_type = #tpu.core_type<tc>} {
    %c0 = arith.constant 0 : index
    %c0_0 = arith.constant 0 : index
    %0 = vector.load %arg0[%c0, %c0_0] : memref<64x300xf32, #tpu.memory_space<vmem>>, vector<64x300xf32>
    %c0_1 = arith.constant 0 : index
    %c0_2 = arith.constant 0 : index
    %1 = vector.load %arg1[%c0_1, %c0_2] : memref<300x256xf32, #tpu.memory_space<vmem>>, vector<300x256xf32>
    %cst = arith.constant dense<0.000000e+00> : vector<64x256xf32>
    %2 = tpu.matmul %0, %1, %cst {dimension_numbers = #tpu.dot_dimension_numbers<[1], [0], [0], [1], [0, 0, 1, 1], [], []>} : vector<64x300xf32>, vector<300x256xf32>, vector<64x256xf32> -> vector<64x256xf32>
    %c0_3 = arith.constant 0 : index
    %c0_4 = arith.constant 0 : index
    %3 = vector.load %arg3[%c0_3, %c0_4] : memref<1x256xf32, #tpu.memory_space<vmem>>, vector<1x256xf32>
    %4 = vector.broadcast %3 : vector<1x256xf32> to vector<64x256xf32>
    %5 = arith.addf %2, %4 : vector<64x256xf32>
    %c0_5 = arith.constant 0 : index
    %c0_6 = arith.constant 0 : index
    %6 = vector.load %arg5[%c0_5, %c0_6] : memref<64x256xf32, #tpu.memory_space<vmem>>, vector<64x256xf32>
    tpu.vector_store %arg5[%c0_5, %c0_6], %5 {strides = array<i32>} : memref<64x256xf32, #tpu.memory_space<vmem>>, vector<64x256xf32>,
    %c0_7 = arith.constant 0 : index
    %c0_8 = arith.constant 0 : index
    %7 = vector.load %arg2[%c0_7, %c0_8] : memref<64x256xf32, #tpu.memory_space<vmem>>, vector<64x256xf32>
    %cst_9 = arith.constant 0.000000e+00 : f32
    %8 = vector.broadcast %cst_9 : f32 to vector<8x64xf32>
    %cst_10 = arith.constant 0.000000e+00 : f32
    %9 = vector.broadcast %cst_10 : f32 to vector<8x64xf32>
    %c0_11 = arith.constant 0 : index
    %c0_12 = arith.constant 0 : index
    %10 = vector.load %arg5[%c0_11, %c0_12] : memref<64x256xf32, #tpu.memory_space<vmem>>, vector<8x256xf32>
    %cst_13 = arith.constant dense<0.000000e+00> : vector<8x256xf32>
    %11 = tpu.matmul %8, %7, %cst_13 {dimension_numbers = #tpu.dot_dimension_numbers<[1], [0], [0], [1], [0, 0, 1, 1], [], []>} : vector<8x64xf32>, vector<64x256xf32>, vector<8x256xf32> -> vector<8x256xf32>
    %12 = arith.addf %10, %11 : vector<8x256xf32>
    %13 = vector.extract_strided_slice %12 {offsets = [0, 0], sizes = [8, 192], strides = [1, 1]} : vector<8x256xf32> to vector<8x192xf32>
    %14 = arith.negf %13 : vector<8x192xf32>
    %15 = math.exp %14 : vector<8x192xf32>
    %cst_14 = arith.constant 1.000000e+00 : f32
    %16 = vector.broadcast %cst_14 : f32 to vector<8x192xf32>
    %17 = arith.addf %16, %15 : vector<8x192xf32>
    %18 = arith.divf %16, %17 : vector<8x192xf32>
    %19 = vector.extract_strided_slice %18 {offsets = [0, 0], sizes = [8, 64], strides = [1, 1]} : vector<8x192xf32> to vector<8x64xf32>
    %20 = vector.extract_strided_slice %18 {offsets = [0, 64], sizes = [8, 64], strides = [1, 1]} : vector<8x192xf32> to vector<8x64xf32>
    %21 = vector.extract_strided_slice %18 {offsets = [0, 128], sizes = [8, 64], strides = [1, 1]} : vector<8x192xf32> to vector<8x64xf32>
    %22 = vector.extract_strided_slice %12 {offsets = [0, 192], sizes = [8, 64], strides = [1, 1]} : vector<8x256xf32> to vector<8x64xf32>
    %23 = math.tanh %22 : vector<8x64xf32>
    %24 = arith.mulf %20, %9 : vector<8x64xf32>
    %25 = arith.mulf %19, %23 : vector<8x64xf32>
    %26 = arith.addf %24, %25 : vector<8x64xf32>
    %27 = math.tanh %26 : vector<8x64xf32>
    %28 = arith.mulf %21, %27 : vector<8x64xf32>
    %c8 = arith.constant 8 : index
    %c0_15 = arith.constant 0 : index
    %29 = vector.load %arg5[%c8, %c0_15] : memref<64x256xf32, #tpu.memory_space<vmem>>, vector<8x256xf32>
    %cst_16 = arith.constant dense<0.000000e+00> : vector<8x256xf32>
    %30 = tpu.matmul %28, %7, %cst_16 {dimension_numbers = #tpu.dot_dimension_numbers<[1], [0], [0], [1], [0, 0, 1, 1], [], []>} : vector<8x64xf32>, vector<64x256xf32>, vector<8x256xf32> -> vector<8x256xf32>
    %31 = arith.addf %29, %30 : vector<8x256xf32>
    %32 = vector.extract_strided_slice %31 {offsets = [0, 0], sizes = [8, 192], strides = [1, 1]} : vector<8x256xf32> to vector<8x192xf32>
    %33 = arith.negf %32 : vector<8x192xf32>
    %34 = math.exp %33 : vector<8x192xf32>
    %cst_17 = arith.constant 1.000000e+00 : f32
    %35 = vector.broadcast %cst_17 : f32 to vector<8x192xf32>
    %36 = arith.addf %35, %34 : vector<8x192xf32>
    %37 = arith.divf %35, %36 : vector<8x192xf32>
    %38 = vector.extract_strided_slice %37 {offsets = [0, 0], sizes = [8, 64], strides = [1, 1]} : vector<8x192xf32> to vector<8x64xf32>
    %39 = vector.extract_strided_slice %37 {offsets = [0, 64], sizes = [8, 64], strides = [1, 1]} : vector<8x192xf32> to vector<8x64xf32>
    %40 = vector.extract_strided_slice %37 {offsets = [0, 128], sizes = [8, 64], strides = [1, 1]} : vector<8x192xf32> to vector<8x64xf32>
    %41 = vector.extract_strided_slice %31 {offsets = [0, 192], sizes = [8, 64], strides = [1, 1]} : vector<8x256xf32> to vector<8x64xf32>
    %42 = math.tanh %41 : vector<8x64xf32>
    %43 = arith.mulf %39, %26 : vector<8x64xf32>
    %44 = arith.mulf %38, %42 : vector<8x64xf32>
    %45 = arith.addf %43, %44 : vector<8x64xf32>
    %46 = math.tanh %45 : vector<8x64xf32>
    %47 = arith.mulf %40, %46 : vector<8x64xf32>
    %c16 = arith.constant 16 : index
    %c0_18 = arith.constant 0 : index
    %48 = vector.load %arg5[%c16, %c0_18] : memref<64x256xf32, #tpu.memory_space<vmem>>, vector<8x256xf32>
    %cst_19 = arith.constant dense<0.000000e+00> : vector<8x256xf32>
    %49 = tpu.matmul %47, %7, %cst_19 {dimension_numbers = #tpu.dot_dimension_numbers<[1], [0], [0], [1], [0, 0, 1, 1], [], []>} : vector<8x64xf32>, vector<64x256xf32>, vector<8x256xf32> -> vector<8x256xf32>
    %50 = arith.addf %48, %49 : vector<8x256xf32>
    %51 = vector.extract_strided_slice %50 {offsets = [0, 0], sizes = [8, 192], strides = [1, 1]} : vector<8x256xf32> to vector<8x192xf32>
    %52 = arith.negf %51 : vector<8x192xf32>
    %53 = math.exp %52 : vector<8x192xf32>
    %cst_20 = arith.constant 1.000000e+00 : f32
    %54 = vector.broadcast %cst_20 : f32 to vector<8x192xf32>
    %55 = arith.addf %54, %53 : vector<8x192xf32>
    %56 = arith.divf %54, %55 : vector<8x192xf32>
    %57 = vector.extract_strided_slice %56 {offsets = [0, 0], sizes = [8, 64], strides = [1, 1]} : vector<8x192xf32> to vector<8x64xf32>
    %58 = vector.extract_strided_slice %56 {offsets = [0, 64], sizes = [8, 64], strides = [1, 1]} : vector<8x192xf32> to vector<8x64xf32>
    %59 = vector.extract_strided_slice %56 {offsets = [0, 128], sizes = [8, 64], strides = [1, 1]} : vector<8x192xf32> to vector<8x64xf32>
    %60 = vector.extract_strided_slice %50 {offsets = [0, 192], sizes = [8, 64], strides = [1, 1]} : vector<8x256xf32> to vector<8x64xf32>
    %61 = math.tanh %60 : vector<8x64xf32>
    %62 = arith.mulf %58, %45 : vector<8x64xf32>
    %63 = arith.mulf %57, %61 : vector<8x64xf32>
    %64 = arith.addf %62, %63 : vector<8x64xf32>
    %65 = math.tanh %64 : vector<8x64xf32>
    %66 = arith.mulf %59, %65 : vector<8x64xf32>
    %c24 = arith.constant 24 : index
    %c0_21 = arith.constant 0 : index
    %67 = vector.load %arg5[%c24, %c0_21] : memref<64x256xf32, #tpu.memory_space<vmem>>, vector<8x256xf32>
    %cst_22 = arith.constant dense<0.000000e+00> : vector<8x256xf32>
    %68 = tpu.matmul %66, %7, %cst_22 {dimension_numbers = #tpu.dot_dimension_numbers<[1], [0], [0], [1], [0, 0, 1, 1], [], []>} : vector<8x64xf32>, vector<64x256xf32>, vector<8x256xf32> -> vector<8x256xf32>
    %69 = arith.addf %67, %68 : vector<8x256xf32>
    %70 = vector.extract_strided_slice %69 {offsets = [0, 0], sizes = [8, 192], strides = [1, 1]} : vector<8x256xf32> to vector<8x192xf32>
    %71 = arith.negf %70 : vector<8x192xf32>
    %72 = math.exp %71 : vector<8x192xf32>
    %cst_23 = arith.constant 1.000000e+00 : f32
    %73 = vector.broadcast %cst_23 : f32 to vector<8x192xf32>
    %74 = arith.addf %73, %72 : vector<8x192xf32>
    %75 = arith.divf %73, %74 : vector<8x192xf32>
    %76 = vector.extract_strided_slice %75 {offsets = [0, 0], sizes = [8, 64], strides = [1, 1]} : vector<8x192xf32> to vector<8x64xf32>
    %77 = vector.extract_strided_slice %75 {offsets = [0, 64], sizes = [8, 64], strides = [1, 1]} : vector<8x192xf32> to vector<8x64xf32>
    %78 = vector.extract_strided_slice %75 {offsets = [0, 128], sizes = [8, 64], strides = [1, 1]} : vector<8x192xf32> to vector<8x64xf32>
    %79 = vector.extract_strided_slice %69 {offsets = [0, 192], sizes = [8, 64], strides = [1, 1]} : vector<8x256xf32> to vector<8x64xf32>
    %80 = math.tanh %79 : vector<8x64xf32>
    %81 = arith.mulf %77, %64 : vector<8x64xf32>
    %82 = arith.mulf %76, %80 : vector<8x64xf32>
    %83 = arith.addf %81, %82 : vector<8x64xf32>
    %84 = math.tanh %83 : vector<8x64xf32>
    %85 = arith.mulf %78, %84 : vector<8x64xf32>
    %c32 = arith.constant 32 : index
    %c0_24 = arith.constant 0 : index
    %86 = vector.load %arg5[%c32, %c0_24] : memref<64x256xf32, #tpu.memory_space<vmem>>, vector<8x256xf32>
    %cst_25 = arith.constant dense<0.000000e+00> : vector<8x256xf32>
    %87 = tpu.matmul %85, %7, %cst_25 {dimension_numbers = #tpu.dot_dimension_numbers<[1], [0], [0], [1], [0, 0, 1, 1], [], []>} : vector<8x64xf32>, vector<64x256xf32>, vector<8x256xf32> -> vector<8x256xf32>
    %88 = arith.addf %86, %87 : vector<8x256xf32>
    %89 = vector.extract_strided_slice %88 {offsets = [0, 0], sizes = [8, 192], strides = [1, 1]} : vector<8x256xf32> to vector<8x192xf32>
    %90 = arith.negf %89 : vector<8x192xf32>
    %91 = math.exp %90 : vector<8x192xf32>
    %cst_26 = arith.constant 1.000000e+00 : f32
    %92 = vector.broadcast %cst_26 : f32 to vector<8x192xf32>
    %93 = arith.addf %92, %91 : vector<8x192xf32>
    %94 = arith.divf %92, %93 : vector<8x192xf32>
    %95 = vector.extract_strided_slice %94 {offsets = [0, 0], sizes = [8, 64], strides = [1, 1]} : vector<8x192xf32> to vector<8x64xf32>
    %96 = vector.extract_strided_slice %94 {offsets = [0, 64], sizes = [8, 64], strides = [1, 1]} : vector<8x192xf32> to vector<8x64xf32>
    %97 = vector.extract_strided_slice %94 {offsets = [0, 128], sizes = [8, 64], strides = [1, 1]} : vector<8x192xf32> to vector<8x64xf32>
    %98 = vector.extract_strided_slice %88 {offsets = [0, 192], sizes = [8, 64], strides = [1, 1]} : vector<8x256xf32> to vector<8x64xf32>
    %99 = math.tanh %98 : vector<8x64xf32>
    %100 = arith.mulf %96, %83 : vector<8x64xf32>
    %101 = arith.mulf %95, %99 : vector<8x64xf32>
    %102 = arith.addf %100, %101 : vector<8x64xf32>
    %103 = math.tanh %102 : vector<8x64xf32>
    %104 = arith.mulf %97, %103 : vector<8x64xf32>
    %c40 = arith.constant 40 : index
    %c0_27 = arith.constant 0 : index
    %105 = vector.load %arg5[%c40, %c0_27] : memref<64x256xf32, #tpu.memory_space<vmem>>, vector<8x256xf32>
    %cst_28 = arith.constant dense<0.000000e+00> : vector<8x256xf32>
    %106 = tpu.matmul %104, %7, %cst_28 {dimension_numbers = #tpu.dot_dimension_numbers<[1], [0], [0], [1], [0, 0, 1, 1], [], []>} : vector<8x64xf32>, vector<64x256xf32>, vector<8x256xf32> -> vector<8x256xf32>
    %107 = arith.addf %105, %106 : vector<8x256xf32>
    %108 = vector.extract_strided_slice %107 {offsets = [0, 0], sizes = [8, 192], strides = [1, 1]} : vector<8x256xf32> to vector<8x192xf32>
    %109 = arith.negf %108 : vector<8x192xf32>
    %110 = math.exp %109 : vector<8x192xf32>
    %cst_29 = arith.constant 1.000000e+00 : f32
    %111 = vector.broadcast %cst_29 : f32 to vector<8x192xf32>
    %112 = arith.addf %111, %110 : vector<8x192xf32>
    %113 = arith.divf %111, %112 : vector<8x192xf32>
    %114 = vector.extract_strided_slice %113 {offsets = [0, 0], sizes = [8, 64], strides = [1, 1]} : vector<8x192xf32> to vector<8x64xf32>
    %115 = vector.extract_strided_slice %113 {offsets = [0, 64], sizes = [8, 64], strides = [1, 1]} : vector<8x192xf32> to vector<8x64xf32>
    %116 = vector.extract_strided_slice %113 {offsets = [0, 128], sizes = [8, 64], strides = [1, 1]} : vector<8x192xf32> to vector<8x64xf32>
    %117 = vector.extract_strided_slice %107 {offsets = [0, 192], sizes = [8, 64], strides = [1, 1]} : vector<8x256xf32> to vector<8x64xf32>
    %118 = math.tanh %117 : vector<8x64xf32>
    %119 = arith.mulf %115, %102 : vector<8x64xf32>
    %120 = arith.mulf %114, %118 : vector<8x64xf32>
    %121 = arith.addf %119, %120 : vector<8x64xf32>
    %122 = math.tanh %121 : vector<8x64xf32>
    %123 = arith.mulf %116, %122 : vector<8x64xf32>
    %c48 = arith.constant 48 : index
    %c0_30 = arith.constant 0 : index
    %124 = vector.load %arg5[%c48, %c0_30] : memref<64x256xf32, #tpu.memory_space<vmem>>, vector<8x256xf32>
    %cst_31 = arith.constant dense<0.000000e+00> : vector<8x256xf32>
    %125 = tpu.matmul %123, %7, %cst_31 {dimension_numbers = #tpu.dot_dimension_numbers<[1], [0], [0], [1], [0, 0, 1, 1], [], []>} : vector<8x64xf32>, vector<64x256xf32>, vector<8x256xf32> -> vector<8x256xf32>
    %126 = arith.addf %124, %125 : vector<8x256xf32>
    %127 = vector.extract_strided_slice %126 {offsets = [0, 0], sizes = [8, 192], strides = [1, 1]} : vector<8x256xf32> to vector<8x192xf32>
    %128 = arith.negf %127 : vector<8x192xf32>
    %129 = math.exp %128 : vector<8x192xf32>
    %cst_32 = arith.constant 1.000000e+00 : f32
    %130 = vector.broadcast %cst_32 : f32 to vector<8x192xf32>
    %131 = arith.addf %130, %129 : vector<8x192xf32>
    %132 = arith.divf %130, %131 : vector<8x192xf32>
    %133 = vector.extract_strided_slice %132 {offsets = [0, 0], sizes = [8, 64], strides = [1, 1]} : vector<8x192xf32> to vector<8x64xf32>
    %134 = vector.extract_strided_slice %132 {offsets = [0, 64], sizes = [8, 64], strides = [1, 1]} : vector<8x192xf32> to vector<8x64xf32>
    %135 = vector.extract_strided_slice %132 {offsets = [0, 128], sizes = [8, 64], strides = [1, 1]} : vector<8x192xf32> to vector<8x64xf32>
    %136 = vector.extract_strided_slice %126 {offsets = [0, 192], sizes = [8, 64], strides = [1, 1]} : vector<8x256xf32> to vector<8x64xf32>
    %137 = math.tanh %136 : vector<8x64xf32>
    %138 = arith.mulf %134, %121 : vector<8x64xf32>
    %139 = arith.mulf %133, %137 : vector<8x64xf32>
    %140 = arith.addf %138, %139 : vector<8x64xf32>
    %141 = math.tanh %140 : vector<8x64xf32>
    %142 = arith.mulf %135, %141 : vector<8x64xf32>
    %c56 = arith.constant 56 : index
    %c0_33 = arith.constant 0 : index
    %143 = vector.load %arg5[%c56, %c0_33] : memref<64x256xf32, #tpu.memory_space<vmem>>, vector<8x256xf32>
    %cst_34 = arith.constant dense<0.000000e+00> : vector<8x256xf32>
    %144 = tpu.matmul %142, %7, %cst_34 {dimension_numbers = #tpu.dot_dimension_numbers<[1], [0], [0], [1], [0, 0, 1, 1], [], []>} : vector<8x64xf32>, vector<64x256xf32>, vector<8x256xf32> -> vector<8x256xf32>
    %145 = arith.addf %143, %144 : vector<8x256xf32>
    %146 = vector.extract_strided_slice %145 {offsets = [0, 0], sizes = [8, 192], strides = [1, 1]} : vector<8x256xf32> to vector<8x192xf32>
    %147 = arith.negf %146 : vector<8x192xf32>
    %148 = math.exp %147 : vector<8x192xf32>
    %cst_35 = arith.constant 1.000000e+00 : f32
    %149 = vector.broadcast %cst_35 : f32 to vector<8x192xf32>
    %150 = arith.addf %149, %148 : vector<8x192xf32>
    %151 = arith.divf %149, %150 : vector<8x192xf32>
    %152 = vector.extract_strided_slice %151 {offsets = [0, 0], sizes = [8, 64], strides = [1, 1]} : vector<8x192xf32> to vector<8x64xf32>
    %153 = vector.extract_strided_slice %151 {offsets = [0, 64], sizes = [8, 64], strides = [1, 1]} : vector<8x192xf32> to vector<8x64xf32>
    %154 = vector.extract_strided_slice %151 {offsets = [0, 128], sizes = [8, 64], strides = [1, 1]} : vector<8x192xf32> to vector<8x64xf32>
    %155 = vector.extract_strided_slice %145 {offsets = [0, 192], sizes = [8, 64], strides = [1, 1]} : vector<8x256xf32> to vector<8x64xf32>
    %156 = math.tanh %155 : vector<8x64xf32>
    %157 = arith.mulf %153, %140 : vector<8x64xf32>
    %158 = arith.mulf %152, %156 : vector<8x64xf32>
    %159 = arith.addf %157, %158 : vector<8x64xf32>
    %160 = math.tanh %159 : vector<8x64xf32>
    %161 = arith.mulf %154, %160 : vector<8x64xf32>
    %162 = vector.extract_strided_slice %161 {offsets = [0, 0], sizes = [2, 64], strides = [1, 1]} : vector<8x64xf32> to vector<2x64xf32>
    %c0_36 = arith.constant 0 : index
    %c0_37 = arith.constant 0 : index
    %163 = vector.load %arg4[%c0_36, %c0_37] : memref<2x64xf32, #tpu.memory_space<vmem>>, vector<2x64xf32>
    tpu.vector_store %arg4[%c0_36, %c0_37], %162 {strides = array<i32>} : memref<2x64xf32, #tpu.memory_space<vmem>>, vector<2x64xf32>,
    return
  }
}

</mosaic_0001>

<bundles_post_ra>
// kernel: lstm_last_hidden.1
= control target key start
LH: loop header
LB: loop body
LE: loop exit
PB: predicated region body
PF: predicated region fallthrough
CT: control target
= control target key end

     0   :  { %9 = vsyncpa [#allocation4], 0  ;;  %s2015_s0 = inlined_call_operand.vmem [shape: f32[64,300], index: 0, kind: input, shape index: {}]   ;;  %s2016_s1 = inlined_call_operand.hbm [shape: f32[300,256], index: 1, kind: input, shape index: {}]   ;;  %s2017_s2 = inlined_call_operand.vmem [shape: f32[64,256], index: 2, kind: input, shape index: {}]   ;;  %s2018_s3 = inlined_call_operand.vmem [shape: f32[1,256], index: 3, kind: input, shape index: {}]   ;;  %s2019_s4 = inlined_call_operand.hbm [shape: f32[2,64], index: 4, kind: output, shape index: {}]  }
   0x1   :  { %10 = vsyncpa [#allocation5], 0  ;;  %s17_s17 = sshll.u32 %s2016_s1, 4  ;;  %s1496_s18 = smov [#allocation3]   ;;  %s18_s17 = int_to_ptr.hbm [resolvable:$true] %s17_s17 }
   0x2   :  { %s19_s19 = sshll.u32 %s1496_s18, 4  ;;  %s1497_s20 = smov 256   ;;  %s20_s19 = int_to_ptr.vmem [resolvable:$true] %s19_s19 }
   0x3   :  { %s1498_s21 = smov 16  }
   0x4   :  { %25 = dma.hbm_to_vmem [thread:$0]  %s18_s17, 9728, %s20_s19, [#allocation4], %s1497_s20, %s1497_s20, %s1498_s21  }
   0x5   :  { %1492 = dma.done.wait [#allocation4], 9728  }
   0x6   :  { %1493 = vsyncadd [#allocation4], 4294957568  ;;  %vm165_vm0 = vcmask 1043456   ;;  %v88_v0 = vld [vmem:[#allocation3 + $0xf0] sm:$0xff]  ;;  %v89_v3 = vld [vmem:[#allocation3 + $0xf8] sm:$0xff]  ;;  %vm140_vm1 = vcmask 359424  }
   0x7   :  { %v120_v1 = vld [vmem:[#allocation3 + $0x1f0] sm:$0xff]  ;;  %172 = vmatpush.msra.mxu0 %v88_v0  ;;  %v86_v4 = vld [vmem:[#allocation3 + $0xe0] sm:$0xff]  ;;  %295 = vmatpush.msra.mxu3 %v89_v3  ;;  %v87_v7 = vld [vmem:[#allocation3 + $0xe8] sm:$0xff]  ;;  %vm452_vm10 = vcmask 523264   ;;  %s1501_s21 = smov [#allocation6]   ;;  %s1284_s24 = sshll.u32 %s2019_s4, 4  ;;  %s1285_s24 = int_to_ptr.hbm [resolvable:$true] %s1284_s24 }
   0x8   :  { %v132_v2 = vld [vmem:[#allocation3 + $0x250] sm:$0xf]  ;;  %213 = vmatpush.msra.mxu1 %v120_v1  ;;  %v118_v5 = vld [vmem:[#allocation3 + $0x1e0] sm:$0xff]  ;;  %v85_v11 = vld [vmem:[#allocation3 + $0xd8] sm:$0xff]  ;;  %s1282_s1 = sshll.u32 %s1501_s21, 4  ;;  %s1283_s1 = int_to_ptr.vmem [resolvable:$true] %s1282_s1 }
   0x9   :  { %1294 = vmatpush.msk.msra.mxu2 %vm165_vm0, %v132_v2  ;;  %v130_v6 = vld [vmem:[#allocation3 + $0x240] sm:$0xff]  ;;  %v84_v8 = vld [vmem:[#allocation3 + $0xd0] sm:$0xff]  ;;  %173 = vmatpush.msra.mxu0 %v86_v4  ;;  %v83_v15 = vld [vmem:[#allocation3 + $0xc8] sm:$0xff] }
   0xa   :  { %214 = vmatpush.msra.mxu1 %v118_v5  ;;  %v116_v9 = vld [vmem:[#allocation3 + $0x1d0] sm:$0xff]  ;;  %296 = vmatpush.msra.mxu3 %v87_v7  ;;  %v82_v12 = vld [vmem:[#allocation3 + $0xc0] sm:$0xff]  ;;  %v81_v19 = vld [vmem:[#allocation3 + $0xb8] sm:$0xff] }
   0xb   :  { %v128_v10 = vld [vmem:[#allocation3 + $0x230] sm:$0xff]  ;;  %265 = vmatpush.msra.mxu2 %v130_v6  ;;  %v114_v13 = vld [vmem:[#allocation3 + $0x1c0] sm:$0xff]  ;;  %174 = vmatpush.msra.mxu0 %v84_v8  ;;  %v79_v23 = vld [vmem:[#allocation3 + $0xa8] sm:$0xff] }
   0xc   :  { %215 = vmatpush.msra.mxu1 %v116_v9  ;;  %v126_v14 = vld [vmem:[#allocation3 + $0x220] sm:$0xff]  ;;  %297 = vmatpush.msra.mxu3 %v85_v11  ;;  %v80_v16 = vld [vmem:[#allocation3 + $0xb0] sm:$0xff]  ;;  %v77_v27 = vld [vmem:[#allocation3 + $0x98] sm:$0xff] }
   0xd   :  { %266 = vmatpush.msra.mxu2 %v128_v10  ;;  %v112_v17 = vld [vmem:[#allocation3 + $0x1b0] sm:$0xff]  ;;  %175 = vmatpush.msra.mxu0 %v82_v12  ;;  %v78_v20 = vld [vmem:[#allocation3 + $0xa0] sm:$0xff]  ;;  %v75_v30 = vld [vmem:[#allocation3 + $0x88] sm:$0xff] }
   0xe   :  { %216 = vmatpush.msra.mxu1 %v114_v13  ;;  %v124_v18 = vld [vmem:[#allocation3 + $0x210] sm:$0xff]  ;;  %298 = vmatpush.msra.mxu3 %v83_v15  ;;  %v110_v21 = vld [vmem:[#allocation3 + $0x1a0] sm:$0xff]  ;;  %v73_v33 = vld [vmem:[#allocation3 + $0x78] sm:$0xff] }
   0xf   :  { %267 = vmatpush.msra.mxu2 %v126_v14  ;;  %176 = vmatpush.msra.mxu0 %v80_v16  ;;  %v122_v22 = vld [vmem:[#allocation3 + $0x200] sm:$0xff]  ;;  %v1534_v24 = vld [vmem:[%s2015_s0 + $0x10] sm:$0xff]  ;;  %v71_v36 = vld [vmem:[#allocation3 + $0x68] sm:$0xff] }
  0x10   :  { %217 = vmatpush.msra.mxu1 %v112_v17  ;;  %299 = vmatpush.msra.mxu3 %v81_v19  ;;  %v76_v25 = vld [vmem:[#allocation3 + $0x90] sm:$0xff]  ;;  %v74_v28 = vld [vmem:[#allocation3 + $0x80] sm:$0xff]  ;;  %v121_v37 = vld [vmem:[#allocation3 + $0x1f8] sm:$0xff] }
  0x11   :  { %268 = vmatpush.msra.mxu2 %v124_v18  ;;  %177 = vmatpush.msra.mxu0 %v78_v20  ;;  %v108_v26 = vld [vmem:[#allocation3 + $0x190] sm:$0xff]  ;;  %v106_v29 = vld [vmem:[#allocation3 + $0x180] sm:$0xff]  ;;  %v1541_v38 = vld [vmem:[%s2015_s0 + $0x28] sm:$0xff] }
  0x12   :  { %218 = vmatpush.msra.mxu1 %v110_v21  ;;  %300 = vmatpush.msra.mxu3 %v79_v23  ;;  %v72_v31 = vld [vmem:[#allocation3 + $0x70] sm:$0xff]  ;;  %v70_v34 = vld [vmem:[#allocation3 + $0x60] sm:$0xff]  ;;  %v69_v41 = vld [vmem:[#allocation3 + $0x58] sm:$0xff] }
  0x13   :  { %269 = vmatpush.msra.mxu2 %v122_v22  ;;  %178 = vmatpush.msra.mxu0 %v76_v25  ;;  %v104_v32 = vld [vmem:[#allocation3 + $0x170] sm:$0xff]  ;;  %v102_v35 = vld [vmem:[#allocation3 + $0x160] sm:$0xff]  ;;  %v119_v43 = vld [vmem:[#allocation3 + $0x1e8] sm:$0xff] }
  0x14   :  { %1295 = vmatmul.msk.f32.vlgmr.msra.gmra.mxu2 %vm140_vm1, %v1534_v24  ;;  %219 = vmatpush.msra.mxu1 %v108_v26  ;;  %v68_v39 = vld [vmem:[#allocation3 + $0x50] sm:$0xff]  ;;  %v66_v42 = vld [vmem:[#allocation3 + $0x40] sm:$0xff]  ;;  %v67_v45 = vld [vmem:[#allocation3 + $0x48] sm:$0xff] }
  0x15   :  { %301 = vmatpush.msra.mxu3 %v77_v27  ;;  %179 = vmatpush.msra.mxu0 %v74_v28  ;;  %v100_v40 = vld [vmem:[#allocation3 + $0x150] sm:$0xff]  ;;  %v98_v44 = vld [vmem:[#allocation3 + $0x140] sm:$0xff]  ;;  %v117_v47 = vld [vmem:[#allocation3 + $0x1d8] sm:$0xff] }
  0x16   :  { %220 = vmatpush.msra.mxu1 %v106_v29  ;;  %336 = vmatpush.msrb.mxu2 %v121_v37  ;;  %v64_v46 = vld [vmem:[#allocation3 + $0x30] sm:$0xff]  ;;  %v65_v49 = vld [vmem:[#allocation3 + $0x38] sm:$0xff]  ;;  %v62_v50 = vld [vmem:[#allocation3 + $0x20] sm:$0xff] }
  0x17   :  { %302 = vmatpush.msra.mxu3 %v75_v30  ;;  %180 = vmatpush.msra.mxu0 %v72_v31  ;;  %v96_v48 = vld [vmem:[#allocation3 + $0x130] sm:$0xff]  ;;  %v115_v51 = vld [vmem:[#allocation3 + $0x1c8] sm:$0xff]  ;;  %v94_v52 = vld [vmem:[#allocation3 + $0x120] sm:$0xff] }
  0x18   :  { %221 = vmatpush.msra.mxu1 %v104_v32  ;;  %337 = vmatpush.msrb.mxu2 %v119_v43  ;;  %v63_v53 = vld [vmem:[#allocation3 + $0x28] sm:$0xff]  ;;  %v1548_v54 = vld [vmem:[%s2015_s0 + $0x40] sm:$0xff]  ;;  %v60_v55 = vld [vmem:[#allocation3 + $0x10] sm:$0xff] }
  0x19   :  { %303 = vmatpush.msra.mxu3 %v73_v33  ;;  %181 = vmatpush.msra.mxu0 %v70_v34  ;;  %v92_v56 = vld [vmem:[#allocation3 + $0x110] sm:$0xff]  ;;  %v61_v57 = vld [vmem:[#allocation3 + $0x18] sm:$0xff]  ;;  %v58_v58 = vld [vmem:[#allocation3] sm:$0xff] }
  0x1a   :  { %222 = vmatpush.msra.mxu1 %v102_v35  ;;  %338 = vmatpush.msrb.mxu2 %v117_v47  ;;  %v113_v59 = vld [vmem:[#allocation3 + $0x1b8] sm:$0xff]  ;;  %v90_v60 = vld [vmem:[#allocation3 + $0x100] sm:$0xff]  ;;  %v59_v61 = vld [vmem:[#allocation3 + $0x8] sm:$0xff] }
  0x1b   :  { %304 = vmatpush.msra.mxu3 %v71_v36  ;;  %182 = vmatpush.msra.mxu0 %v68_v39  ;;  %v34_v62 = vld [vmem:[%s2015_s0] sm:$0xff]  ;;  %v1558_v63 = vld [vmem:[%s2015_s0 + $0x8] sm:$0xff]  ;;  %v133_v0 = vld [vmem:[#allocation3 + $0x258] sm:$0xf] }
  0x1c   :  { %1296 = vmatmul.msk.f32.gmra.mxu2 %vm140_vm1, %v1541_v38  ;;  %223 = vmatpush.msra.mxu1 %v100_v40  ;;  %v1563_v1 = vld [vmem:[%s2017_s2 + $0x78] sm:$0xff]  ;;  %v111_v2 = vld [vmem:[#allocation3 + $0x1a8] sm:$0xff]  ;;  %v1592_v12 = vld [vmem:[%s2015_s0 + $0x20] sm:$0xff] }
  0x1d   :  { %305 = vmatpush.msra.mxu3 %v69_v41  ;;  %183 = vmatpush.msra.mxu0 %v66_v42  ;;  %v131_v3 = vld [vmem:[#allocation3 + $0x248] sm:$0xff]  ;;  %v1569_v4 = vld [vmem:[%s2015_s0 + $0x58] sm:$0xff]  ;;  %v1604_v16 = vld [vmem:[%s2015_s0 + $0x70] sm:$0xff] }
  0x1e   :  { %224 = vmatpush.msra.mxu1 %v98_v44  ;;  %339 = vmatpush.msrb.mxu2 %v115_v51  ;;  %v1575_v5 = vld [vmem:[%s2017_s2 + $0x68] sm:$0xff]  ;;  %v109_v6 = vld [vmem:[#allocation3 + $0x198] sm:$0xff]  ;;  %v40_v22 = vld [vmem:[%s2015_s0 + $0x30] sm:$0xff] }
  0x1f   :  { %306 = vmatpush.msra.mxu3 %v67_v45  ;;  %184 = vmatpush.msra.mxu0 %v64_v46  ;;  %v129_v7 = vld [vmem:[#allocation3 + $0x238] sm:$0xff]  ;;  %v107_v9 = vld [vmem:[#allocation3 + $0x188] sm:$0xff]  ;;  %v1643_v29 = vld [vmem:[%s2017_s2 + $0x70] sm:$0xff] }
  0x20   :  { %225 = vmatpush.msra.mxu1 %v96_v48  ;;  %340 = vmatpush.msrb.mxu2 %v113_v59  ;;  %v1581_v8 = vld [vmem:[%s2017_s2 + $0x58] sm:$0xff]  ;;  %v127_v10 = vld [vmem:[#allocation3 + $0x228] sm:$0xff]  ;;  %v1648_v30 = vld [vmem:[%s2017_s2 + $0x60] sm:$0xff] }
  0x21   :  { %307 = vmatpush.msra.mxu3 %v65_v49  ;;  %185 = vmatpush.msra.mxu0 %v62_v50  ;;  %v37_v11 = vld [vmem:[%s2015_s0 + $0x18] sm:$0xff]  ;;  %v1598_v14 = vld [vmem:[%s2017_s2 + $0x48] sm:$0xff]  ;;  %v1658_v33 = vld [vmem:[%s2017_s2 + $0x50] sm:$0xff] }
  0x22   :  { %226 = vmatpush.msra.mxu1 %v94_v52  ;;  %341 = vmatpush.msrb.mxu2 %v111_v2  ;;  %v105_v13 = vld [vmem:[#allocation3 + $0x178] sm:$0xff]  ;;  %v103_v15 = vld [vmem:[#allocation3 + $0x168] sm:$0xff]  ;;  %v1666_v35 = vld [vmem:[%s2015_s0 + $0x50] sm:$0xff] }
  0x23   :  { %308 = vmatpush.msra.mxu3 %v63_v53  ;;  %186 = vmatpush.msra.mxu0 %v60_v55  ;;  %v1609_v17 = vld [vmem:[%s2017_s2 + $0x38] sm:$0xff]  ;;  %v1615_v19 = vld [vmem:[%s2017_s2 + $0x28] sm:$0xff]  ;;  %v1672_v36 = vld [vmem:[%s2017_s2 + $0x40] sm:$0xff]  ;;  %v1499_v55 = vmov 0.0  }
  0x24   :  { %1297 = vmatmul.msk.f32.gmra.mxu2 %vm140_vm1, %v1548_v54  ;;  %227 = vmatpush.msra.mxu1 %v92_v56  ;;  %v101_v18 = vld [vmem:[#allocation3 + $0x158] sm:$0xff]  ;;  %v99_v20 = vld [vmem:[#allocation3 + $0x148] sm:$0xff]  ;;  %v1678_v37 = vld [vmem:[%s2015_s0 + $0xa0] sm:$0xff] }
  0x25   :  { %309 = vmatpush.msra.mxu3 %v61_v57  ;;  %187 = vmatpush.msra.mxu0 %v58_v58  ;;  %v125_v21 = vld [vmem:[#allocation3 + $0x218] sm:$0xff]  ;;  %v1633_v26 = vld [vmem:[%s2015_s0 + $0x88] sm:$0xff]  ;;  %v1689_v40 = vld [vmem:[%s2017_s2 + $0x30] sm:$0xff] }
  0x26   :  { %228 = vmatpush.msra.mxu1 %v90_v60  ;;  %188 = vmatmul.f32.vlgmr.msra.gmra.mxu0 %v34_v62  ;;  %v1626_v23 = vld [vmem:[%s2015_s0 + $0x38] sm:$0xff]  ;;  %v95_v27 = vld [vmem:[#allocation3 + $0x128] sm:$0xff]  ;;  %v1695_v42 = vld [vmem:[%s2017_s2 + $0x20] sm:$0xff] }
  0x27   :  { %310 = vmatpush.msra.mxu3 %v59_v61  ;;  %229 = vmatmul.f32.vlgmr.msra.gmra.mxu1 %v1558_v63  ;;  %v97_v25 = vld [vmem:[#allocation3 + $0x138] sm:$0xff]  ;;  %v91_v32 = vld [vmem:[#allocation3 + $0x108] sm:$0xff]  ;;  %v1704_v43 = vld [vmem:[%s2017_s2 + $0x10] sm:$0xff] }
  0x28   :  { %311 = vmatmul.f32.vlgmr.msra.gmra.mxu3 %v34_v62  ;;  %1303 = vmatpush.msk.msrb.mxu0 %vm165_vm0, %v133_v0  ;;  %v1638_v28 = vld [vmem:[%s2017_s2 + $0x18] sm:$0xff]  ;;  %v43_v34 = vld [vmem:[%s2015_s0 + $0x48] sm:$0xff]  ;;  %v46_v44 = vld [vmem:[%s2015_s0 + $0x60] sm:$0xff] }
  0x29   :  { %484 = vmatpush.msrb.mxu3 %v1563_v1  ;;  %342 = vmatpush.msrb.mxu2 %v109_v6  ;;  %v93_v31 = vld [vmem:[#allocation3 + $0x118] sm:$0xff]  ;;  %v1684_v39 = vld [vmem:[%s2017_s2 + $0x8] sm:$0xff]  ;;  %v1720_v46 = vld [vmem:[%s2017_s2] sm:$0xff] }
  0x2a   :  { %388 = vmatpush.msrb.mxu0 %v131_v3  ;;  %464 = vmatpush.msrb.mxu1 %v1643_v29  ;;  %v123_v41 = vld [vmem:[#allocation3 + $0x208] sm:$0xff]  ;;  %v1730_v47 = vld [vmem:[%s2015_s0 + $0xb8] sm:$0xff]  ;;  %v1746_v49 = vld [vmem:[%s2015_s0 + $0x80] sm:$0xff] }
  0x2b   :  { %485 = vmatpush.msrb.mxu3 %v1575_v5  ;;  %343 = vmatpush.msrb.mxu2 %v107_v9  ;;  %v1713_v45 = vld [vmem:[%s2015_s0 + $0x68] sm:$0xff]  ;;  %v49_v48 = vld [vmem:[%s2015_s0 + $0x78] sm:$0xff]  ;;  %v52_v50 = vld [vmem:[%s2015_s0 + $0x90] sm:$0xff] }
  0x2c   :  { %1298 = vmatmul.msk.f32.gmra.mxu2 %vm140_vm1, %v1569_v4  ;;  %389 = vmatpush.msrb.mxu0 %v129_v7  ;;  %v53_v51 = vld [vmem:[%s2015_s0 + $0x98] sm:$0xff]  ;;  %v55_v52 = vld [vmem:[%s2015_s0 + $0xa8] sm:$0xff]  ;;  %v56_v53 = vld [vmem:[%s2015_s0 + $0xb0] sm:$0xff] }
  0x2d   :  { %486 = vmatpush.msrb.mxu3 %v1581_v8  ;;  %344 = vmatpush.msrb.mxu2 %v105_v13 }
  0x2e   :  { %390 = vmatpush.msrb.mxu0 %v127_v10  ;;  %465 = vmatpush.msrb.mxu1 %v1648_v30 }
  0x2f   :  { %191 = vmatmul.f32.gmra.mxu0 %v37_v11  ;;  %232 = vmatmul.f32.gmra.mxu1 %v1592_v12 }
  0x30   :  { %314 = vmatmul.f32.gmra.mxu3 %v37_v11  ;;  %345 = vmatpush.msrb.mxu2 %v103_v15 }
  0x31   :  { %487 = vmatpush.msrb.mxu3 %v1598_v14  ;;  %391 = vmatpush.msrb.mxu0 %v125_v21 }
  0x32   :  { %346 = vmatpush.msrb.mxu2 %v101_v18  ;;  %466 = vmatpush.msrb.mxu1 %v1658_v33 }
  0x33   :  { %488 = vmatpush.msrb.mxu3 %v1609_v17  ;;  %392 = vmatpush.msrb.mxu0 %v123_v41 }
  0x34   :  { %1299 = vmatmul.msk.f32.gmra.mxu2 %vm140_vm1, %v1604_v16  ;;  %467 = vmatpush.msrb.mxu1 %v1672_v36 }
  0x35   :  { %489 = vmatpush.msrb.mxu3 %v1615_v19  ;;  %347 = vmatpush.msrb.mxu2 %v99_v20 }
  0x36   :  { %468 = vmatpush.msrb.mxu1 %v1689_v40  ;;  %979 = vmatpush.msra.mxu0 %v1643_v29 }
  0x37   :  { %194 = vmatmul.f32.gmra.mxu0 %v40_v22  ;;  %235 = vmatmul.f32.gmra.mxu1 %v1626_v23 }
  0x38   :  { %317 = vmatmul.f32.gmra.mxu3 %v40_v22  ;;  %348 = vmatpush.msrb.mxu2 %v97_v25 }
  0x39   :  { %490 = vmatpush.msrb.mxu3 %v1638_v28  ;;  %469 = vmatpush.msrb.mxu1 %v1695_v42 }
  0x3a   :  { %349 = vmatpush.msrb.mxu2 %v95_v27  ;;  %980 = vmatpush.msra.mxu0 %v1648_v30 }
  0x3b   :  { %491 = vmatpush.msrb.mxu3 %v1684_v39  ;;  %470 = vmatpush.msrb.mxu1 %v1704_v43 }
  0x3c   :  { %1300 = vmatmul.msk.f32.gmra.mxu2 %vm140_vm1, %v1633_v26  ;;  %981 = vmatpush.msra.mxu0 %v1658_v33 }
  0x3d   :  { %350 = vmatpush.msrb.mxu2 %v93_v31  ;;  %587 = vmatpush.msra.mxu3 %v1563_v1 }
  0x3e   :  { %471 = vmatpush.msrb.mxu1 %v1720_v46  ;;  %982 = vmatpush.msra.mxu0 %v1672_v36 }
  0x3f   :  { %351 = vmatpush.msrb.mxu2 %v91_v32  ;;  %197 = vmatmul.f32.gmra.mxu0 %v43_v34 }
  0x40   :  { %238 = vmatmul.f32.gmra.mxu1 %v1666_v35  ;;  %320 = vmatmul.f32.gmra.mxu3 %v43_v34 }
  0x41   :  { %588 = vmatpush.msra.mxu3 %v1575_v5  ;;  %773 = vmatpush.msra.mxu2 %v1643_v29 }
  0x42   :  { %567 = vmatpush.msra.mxu1 %v1643_v29  ;;  %983 = vmatpush.msra.mxu0 %v1689_v40 }
  0x43   :  { %589 = vmatpush.msra.mxu3 %v1581_v8  ;;  %774 = vmatpush.msra.mxu2 %v1648_v30 }
  0x44   :  { %1301 = vmatmul.msk.f32.gmra.mxu2 %vm140_vm1, %v1678_v37  ;;  %568 = vmatpush.msra.mxu1 %v1648_v30 }
  0x45   :  { %590 = vmatpush.msra.mxu3 %v1598_v14  ;;  %775 = vmatpush.msra.mxu2 %v1658_v33 }
  0x46   :  { %569 = vmatpush.msra.mxu1 %v1658_v33  ;;  %984 = vmatpush.msra.mxu0 %v1695_v42 }
  0x47   :  { %200 = vmatmul.f32.gmra.mxu0 %v46_v44  ;;  %591 = vmatpush.msra.mxu3 %v1609_v17 }
  0x48   :  { %241 = vmatmul.f32.gmra.mxu1 %v1713_v45  ;;  %323 = vmatmul.f32.gmra.mxu3 %v46_v44 }
  0x49   :  { %592 = vmatpush.msra.mxu3 %v1615_v19  ;;  %776 = vmatpush.msra.mxu2 %v1672_v36 }
  0x4a   :  { %570 = vmatpush.msra.mxu1 %v1672_v36  ;;  %985 = vmatpush.msra.mxu0 %v1704_v43 }
  0x4b   :  { %593 = vmatpush.msra.mxu3 %v1638_v28  ;;  %777 = vmatpush.msra.mxu2 %v1689_v40 }
  0x4c   :  { %1302 = vmatmul.msk.f32.gmra.mxu2 %vm140_vm1, %v1730_v47  ;;  %571 = vmatpush.msra.mxu1 %v1689_v40 }
  0x4d   :  { %594 = vmatpush.msra.mxu3 %v1684_v39  ;;  %778 = vmatpush.msra.mxu2 %v1695_v42 }
  0x4e   :  { %572 = vmatpush.msra.mxu1 %v1695_v42  ;;  %986 = vmatpush.msra.mxu0 %v1720_v46 }
  0x4f   :  { %203 = vmatmul.f32.gmra.mxu0 %v49_v48  ;;  %779 = vmatpush.msra.mxu2 %v1704_v43 }
  0x50   :  { %244 = vmatmul.f32.gmra.mxu1 %v1746_v49  ;;  %326 = vmatmul.f32.gmra.mxu3 %v49_v48 }
  0x51   :  { %573 = vmatpush.msra.mxu1 %v1704_v43  ;;  %780 = vmatpush.msra.mxu2 %v1720_v46 }
  0x53   :  { %574 = vmatpush.msra.mxu1 %v1720_v46 }
  0x54   :  { %352 = vmatmul.f32.vlgmr.msrb.gmra.mxu2 %v1558_v63 }
  0x55   :  { %896 = vmatpush.msrb.mxu2 %v1563_v1 }
  0x57   :  { %206 = vmatmul.f32.gmra.mxu0 %v52_v50  ;;  %897 = vmatpush.msrb.mxu2 %v1575_v5 }
  0x58   :  { %247 = vmatmul.f32.gmra.mxu1 %v53_v51  ;;  %329 = vmatmul.f32.gmra.mxu3 %v52_v50 }
  0x59   :  { %898 = vmatpush.msrb.mxu2 %v1581_v8 }
  0x5b   :  { %899 = vmatpush.msrb.mxu2 %v1598_v14 }
  0x5c   :  { %355 = vmatmul.f32.gmra.mxu2 %v1592_v12 }
  0x5d   :  { %900 = vmatpush.msrb.mxu2 %v1609_v17 }
  0x5f   :  { %209 = vmatmul.f32.gmra.mxu0 %v55_v52  ;;  %901 = vmatpush.msrb.mxu2 %v1615_v19 }
  0x60   :  { %250 = vmatmul.f32.gmra.mxu1 %v56_v53  ;;  %332 = vmatmul.f32.gmra.mxu3 %v55_v52 }
  0x61   :  { %902 = vmatpush.msrb.mxu2 %v1638_v28 }
  0x63   :  { %903 = vmatpush.msrb.mxu2 %v1684_v39 }
  0x64   :  { %358 = vmatmul.f32.gmra.mxu2 %v1626_v23 }
  0x67   :  { %1304 = vmatmul.msk.f32.vlgmr.msrb.gmra.mxu0 %vm140_vm1, %v1534_v24 }
  0x68   :  { %472 = vmatmul.f32.vlgmr.msrb.gmra.mxu1 %v1499_v55  ;;  %492 = vmatmul.f32.vlgmr.msrb.gmra.mxu3 %v1499_v55 }
  0x69   :  { %670 = vmatpush.msrb.mxu1 %v1643_v29  ;;  %690 = vmatpush.msrb.mxu3 %v1563_v1 }
  0x6a   :  { %1185 = vmatpush.msrb.mxu0 %v1643_v29 }
  0x6b   :  { %671 = vmatpush.msrb.mxu1 %v1648_v30  ;;  %691 = vmatpush.msrb.mxu3 %v1575_v5 }
  0x6c   :  { %361 = vmatmul.f32.gmra.mxu2 %v1666_v35  ;;  %1186 = vmatpush.msrb.mxu0 %v1648_v30 }
  0x6d   :  { %672 = vmatpush.msrb.mxu1 %v1658_v33  ;;  %692 = vmatpush.msrb.mxu3 %v1581_v8 }
  0x6e   :  { %1187 = vmatpush.msrb.mxu0 %v1658_v33 }
  0x6f   :  { %673 = vmatpush.msrb.mxu1 %v1672_v36  ;;  %1305 = vmatmul.msk.f32.gmra.mxu0 %vm140_vm1, %v1541_v38 }
  0x70   :  { %693 = vmatpush.msrb.mxu3 %v1598_v14  ;;  %1188 = vmatpush.msrb.mxu0 %v1672_v36 }
  0x71   :  { %674 = vmatpush.msrb.mxu1 %v1689_v40 }
  0x72   :  { %694 = vmatpush.msrb.mxu3 %v1609_v17  ;;  %1189 = vmatpush.msrb.mxu0 %v1689_v40 }
  0x73   :  { %675 = vmatpush.msrb.mxu1 %v1695_v42 }
  0x74   :  { %364 = vmatmul.f32.gmra.mxu2 %v1713_v45  ;;  %695 = vmatpush.msrb.mxu3 %v1615_v19 }
  0x75   :  { %676 = vmatpush.msrb.mxu1 %v1704_v43  ;;  %1190 = vmatpush.msrb.mxu0 %v1695_v42 }
  0x76   :  { %696 = vmatpush.msrb.mxu3 %v1638_v28 }
  0x77   :  { %677 = vmatpush.msrb.mxu1 %v1720_v46  ;;  %1191 = vmatpush.msrb.mxu0 %v1704_v43 }
  0x78   :  { %1306 = vmatmul.msk.f32.gmra.mxu0 %vm140_vm1, %v1548_v54  ;;  %697 = vmatpush.msrb.mxu3 %v1684_v39  ;;  %v134_v54 = vld [vmem:[%s2018_s3] sm:$0x3]  ;;  %s1500_s3 = smov 64  }
  0x79   :  { %1192 = vmatpush.msrb.mxu0 %v1720_v46  ;;  %v136_v56 = vperm.slane %v134_v54, 0  ;;  %v137_v9 = vperm.slane %v134_v54, 1 }
  0x7c   :  { %367 = vmatmul.f32.gmra.mxu2 %v1746_v49 }
  0x80   :  { %1307 = vmatmul.msk.f32.gmra.mxu0 %vm140_vm1, %v1569_v4 }
  0x84   :  { %370 = vmatmul.f32.gmra.mxu2 %v53_v51 }
  0x88   :  { %1308 = vmatmul.msk.f32.gmra.mxu0 %vm140_vm1, %v1604_v16 }
  0x8c   :  { %373 = vmatmul.f32.gmra.mxu2 %v56_v53 }
  0x90   :  { %1309 = vmatmul.msk.f32.gmra.mxu0 %vm140_vm1, %v1633_v26 }
  0x97   :  { %v271_v24 = vpop.f32.mrf.mxu2 }
  0x98   :  { %1310 = vmatmul.msk.f32.gmra.mxu0 %vm140_vm1, %v1678_v37 }
  0x9f   :  { %v274_v38 = vpop.f32.mrf.mxu2 }
  0xa0   :  { %1311 = vmatmul.msk.f32.gmra.mxu0 %vm140_vm1, %v1730_v47 }
  0xa3   :  { %v189_v57 = vpop.f32.mrf.mxu0 }
  0xa4   :  { %v230_v58 = vpop.f32.mrf.mxu1  ;;  %v190_v59 = vadd.f32 %v189_v57, %v136_v56 }
  0xa6   :  { %v231_v61 = vadd.f32 %v230_v58, %v190_v59 }
  0xa7   :  { %v277_v60 = vpop.f32.mrf.mxu2 }
  0xa8   :  { %v1839_v62 = vadd.f32 %v271_v24, %v231_v61 }
  0xab   :  { %v312_v63 = vpop.f32.mrf.mxu3 }
  0xac   :  { %v192_v0 = vpop.f32.mrf.mxu0  ;;  %v233_v2 = vpop.f32.mrf.mxu1 }
  0xad   :  { %v193_v3 = vadd.f32 %v192_v0, %v136_v56 }
  0xaf   :  { %v280_v4 = vpop.f32.mrf.mxu2  ;;  %v234_v6 = vadd.f32 %v233_v2, %v193_v3 }
  0xb1   :  { %v1841_v7 = vadd.f32 %v274_v38, %v234_v6 }
  0xb3   :  { %v315_v10 = vpop.f32.mrf.mxu3 }
  0xb4   :  { %v1843_v11 = vadd.f32 %v315_v10, %v137_v9  ;;  %v195_v12 = vpop.f32.mrf.mxu0  ;;  %v236_v13 = vpop.f32.mrf.mxu1 }
  0xb5   :  { %v196_v15 = vadd.f32 %v195_v12, %v136_v56 }
  0xb7   :  { %v283_v16 = vpop.f32.mrf.mxu2  ;;  %v237_v18 = vadd.f32 %v236_v13, %v196_v15 }
  0xb9   :  { %v1845_v20 = vadd.f32 %v277_v60, %v237_v18 }
  0xbb   :  { %v318_v21 = vpop.f32.mrf.mxu3 }
  0xbc   :  { %v1847_v22 = vadd.f32 %v318_v21, %v137_v9  ;;  %v198_v23 = vpop.f32.mrf.mxu0 }
  0xbd   :  { %v239_v25 = vpop.f32.mrf.mxu1  ;;  %v199_v26 = vadd.f32 %v198_v23, %v136_v56 }
  0xbf   :  { %v286_v27 = vpop.f32.mrf.mxu2  ;;  %v240_v31 = vadd.f32 %v239_v25, %v199_v26  ;;  %v313_v25 = vadd.f32 %v312_v63, %v137_v9 }
  0xc1   :  { %v1849_v32 = vadd.f32 %v280_v4, %v240_v31 }
  0xc3   :  { %v321_v34 = vpop.f32.mrf.mxu3 }
  0xc4   :  { %v1851_v35 = vadd.f32 %v321_v34, %v137_v9  ;;  %v201_v37 = vpop.f32.mrf.mxu0 }
  0xc5   :  { %v242_v41 = vpop.f32.mrf.mxu1  ;;  %v202_v44 = vadd.f32 %v201_v37, %v136_v56 }
  0xc7   :  { %v289_v45 = vpop.f32.mrf.mxu2  ;;  %v243_v47 = vadd.f32 %v242_v41, %v202_v44 }
  0xc9   :  { %v1853_v48 = vadd.f32 %v283_v16, %v243_v47 }
  0xcb   :  { %v324_v49 = vpop.f32.mrf.mxu3 }
  0xcc   :  { %v325_v50 = vadd.f32 %v324_v49, %v137_v9  ;;  %v204_v51 = vpop.f32.mrf.mxu0 }
  0xcd   :  { %v245_v52 = vpop.f32.mrf.mxu1  ;;  %v205_v53 = vadd.f32 %v204_v51, %v136_v56 }
  0xcf   :  { %v292_v55 = vpop.f32.mrf.mxu2  ;;  %v246_v24 = vadd.f32 %v245_v52, %v205_v53 }
  0xd1   :  { %v1855_v38 = vadd.f32 %v286_v27, %v246_v24 }
  0xd3   :  { %v327_v54 = vpop.f32.mrf.mxu3 }
  0xd4   :  { %v328_v57 = vadd.f32 %v327_v54, %v137_v9  ;;  %v207_v58 = vpop.f32.mrf.mxu0 }
  0xd5   :  { %v248_v59 = vpop.f32.mrf.mxu1  ;;  %v208_v60 = vadd.f32 %v207_v58, %v136_v56 }
  0xd7   :  { %v353_v61 = vpop.f32.mrf.mxu2  ;;  %v249_v0 = vadd.f32 %v248_v59, %v208_v60 }
  0xd8   :  { %v354_v27 = vadd.f32 %v353_v61, %v313_v25 }
  0xd9   :  { %v1857_v2 = vadd.f32 %v289_v45, %v249_v0 }
  0xdb   :  { %v330_v3 = vpop.f32.mrf.mxu3 }
  0xdc   :  { %v331_v4 = vadd.f32 %v330_v3, %v137_v9  ;;  %v210_v6 = vpop.f32.mrf.mxu0 }
  0xdd   :  { %v211_v10 = vadd.f32 %v210_v6, %v136_v56  ;;  %v251_v12 = vpop.f32.mrf.mxu1 }
  0xdf   :  { %v1859_v13 = vpop.f32.mrf.mxu2  ;;  %v252_v15 = vadd.f32 %v251_v12, %v211_v10 }
  0xe1   :  { %v1861_v16 = vadd.f32 %v292_v55, %v252_v15 }
  0xe3   :  { %v333_v18 = vpop.f32.mrf.mxu3 }
  0xe4   :  { %v1863_v21 = vadd.f32 %v333_v18, %v137_v9  ;;  %v394_v23 = vpop.f32.mrf.mxu0 }
  0xe5   :  { %v395_v31 = vadd.f32 %v394_v23, %v354_v27  ;;  %v473_v59 = vpop.f32.mrf.mxu1 }
  0xe6   :  { %v496_v60 = vadd.f32 %v473_v59, %v1839_v62 }
  0xe7   :  { %v1865_v26 = vpop.f32.mrf.mxu2 }
  0xe8   :  { %v1312_v61 = vmul.f32 -1.442695, %v496_v60 }
  0xeb   :  { %v493_v34 = vpop.f32.mrf.mxu3 }
  0xec   :  { %v497_v37 = vadd.f32 %v493_v34, %v395_v31  ;;  %v1867_v41 = vpop.f32.mrf.mxu0 }
  0xee   :  { %1348 = vtanh.f32 %v497_v37 }
  0xef   :  { %v1869_v56 = vpop.f32.mrf.mxu2  ;;  %1350 = vpow2.f32 %v1312_v61 }
  0xf4   :  { %v1349_v44 = vpop.eup %1348 }
  0xf5   :  { %v1871_v45 = vpop.f32.mrf.mxu0  ;;  %539 = vrot.lane.b32.xlu0 %v1349_v44, %s1500_s3 }
  0xf7   :  { %v365_v47 = vpop.f32.mrf.mxu2 }
  0xf8   :  { %v1874_v49 = vadd.f32 %v365_v47, %v325_v50  ;;  %v1351_v50 = vpop.eup %1350 }
  0xf9   :  { %v504_v0 = vadd.f32 1.0, %v1351_v50 }
  0xfb   :  { %1352 = vrcp.f32 %v504_v0  ;;  %vm511_vm3 = vweird.f32 %v504_v0  ;;  %v515_v15 = vand.u32 2147483647, %v504_v0 }
  0xfd   :  { %v1876_v63 = vpop.f32.mrf.mxu0  ;;  %vm516_vm5 = vcmp.eq.f32.partialorder %v515_v15, 8.507059e+37 }
  0xff   :  { %v368_v9 = vpop.f32.mrf.mxu2 }
 0x100   :  { %v1878_v51 = vadd.f32 %v368_v9, %v328_v57  ;;  %v1313_v9 = vmul.f32 -1.442695, %v497_v37 }
 0x101   :  { %v1353_v3 = vpop.eup %1352 }
 0x102   :  { %v507_v57 = vmul.f32 %v1353_v3, %v504_v0  ;;  %vm512_vm2 = vweird.f32 %v1353_v3 }
 0x103   :  { %vm513_vm4 = vmor %vm511_vm3, %vm512_vm2 }
 0x104   :  { %v508_v6 = vsub.f32 1.0, %v507_v57 }
 0x105   :  { %v1880_v52 = vpop.f32.mrf.mxu0 }
 0x106   :  { %v509_v10 = vmul.f32 %v1353_v3, %v508_v6 }
 0x107   :  { %v371_v53 = vpop.f32.mrf.mxu2 }
 0x108   :  { %v372_v55 = vadd.f32 %v371_v53, %v331_v4  ;;  %v510_v12 = vadd.f32 %v1353_v3, %v509_v10  ;;  %v517_v4 = vand.u32 2147483648, %v504_v0 }
 0x10a   :  { %v514_v18 = vsel %vm513_vm4, %v1353_v3, %v510_v12  ;;  %v518_v23 = vor.u32 1.1754944e-38, %v517_v4  ;;  %v357_v4 = vadd.f32 %v1859_v13, %v1843_v11 }
 0x10c   :  { %v519_v62 = vsel %vm516_vm5, %v518_v23, %v514_v18  ;;  %v398_v15 = vadd.f32 %v1867_v41, %v357_v4 }
 0x10d   :  { %v1882_v24 = vpop.f32.mrf.mxu0  ;;  %v537_v31 = vmul.f32 0.0, %v519_v62 }
 0x115   :  { %v412_v54 = vpop.f32.mrf.mxu0 }
 0x116   :  { %v1884_v58 = vadd.f32 %v412_v54, %v372_v55 }
 0x167   :  { %v540_v25 = vpop.permute.xlu0 %539 }
 0x168   :  { %v542_v27 = vmul.f32 %v540_v25, %v519_v62 }
 0x16a   :  { %544 = vrot.lane.b32.xlu0 %v542_v27, %s1500_s3 }
 0x1dc   :  { %v545_v34 = vpop.permute.xlu0 %544 }
 0x1dd   :  { %v1888_v44 = vadd.f32 %v545_v34, %v537_v31 }
 0x1df   :  { %1354 = vtanh.f32 %v1888_v44 }
 0x1e0   :  { %1356 = vpow2.f32 %v1313_v9 }
 0x1e5   :  { %v1355_v47 = vpop.eup %1354 }
 0x1e6   :  { %550 = vrot.lane.b32.xlu1 %v1355_v47, %s1500_s3  ;;  %v1357_v53 = vpop.eup %1356 }
 0x1e7   :  { %v505_v55 = vadd.f32 1.0, %v1357_v53 }
 0x1e9   :  { %1358 = vrcp.f32 %v505_v55  ;;  %v532_v0 = vand.u32 2147483648, %v505_v55  ;;  %vm526_vm7 = vweird.f32 %v505_v55  ;;  %v530_v3 = vand.u32 2147483647, %v505_v55 }
 0x1eb   :  { %v533_v6 = vor.u32 1.1754944e-38, %v532_v0  ;;  %vm531_vm9 = vcmp.eq.f32.partialorder %v530_v3, 8.507059e+37 }
 0x1ef   :  { %v1359_v54 = vpop.eup %1358 }
 0x1f0   :  { %v522_v59 = vmul.f32 %v1359_v54, %v505_v55  ;;  %vm527_vm6 = vweird.f32 %v1359_v54 }
 0x1f1   :  { %vm528_vm8 = vmor %vm526_vm7, %vm527_vm6 }
 0x1f2   :  { %v523_v60 = vsub.f32 1.0, %v522_v59 }
 0x1f4   :  { %v524_v61 = vmul.f32 %v1359_v54, %v523_v60 }
 0x1f6   :  { %v525_v50 = vadd.f32 %v1359_v54, %v524_v61 }
 0x1f8   :  { %v529_v57 = vsel %vm528_vm8, %v1359_v54, %v525_v50 }
 0x1f9   :  { %v534_v10 = vsel %vm531_vm9, %v533_v6, %v529_v57 }
 0x258   :  { %v551_v12 = vpop.permute.xlu1 %550 }
 0x259   :  { %v553_v37 = vmul.f32 %v551_v12, %v534_v10 }
 0x25b   :  { %1314 = vmatmul.msk.f32.vlgmr.msra.gmra.mxu1 %vm452_vm10, %v553_v37  ;;  %1315 = vmatmul.msk.f32.vlgmr.msra.gmra.mxu3 %vm452_vm10, %v553_v37 }
 0x25c   :  { %793 = vmatpush.msra.mxu1 %v1563_v1  ;;  %876 = vmatpush.msra.mxu3 %v1643_v29 }
 0x25e   :  { %794 = vmatpush.msra.mxu1 %v1575_v5  ;;  %877 = vmatpush.msra.mxu3 %v1648_v30 }
 0x260   :  { %795 = vmatpush.msra.mxu1 %v1581_v8  ;;  %878 = vmatpush.msra.mxu3 %v1658_v33 }
 0x262   :  { %796 = vmatpush.msra.mxu1 %v1598_v14  ;;  %879 = vmatpush.msra.mxu3 %v1672_v36 }
 0x264   :  { %797 = vmatpush.msra.mxu1 %v1609_v17  ;;  %880 = vmatpush.msra.mxu3 %v1689_v40 }
 0x266   :  { %798 = vmatpush.msra.mxu1 %v1615_v19  ;;  %881 = vmatpush.msra.mxu3 %v1695_v42 }
 0x268   :  { %799 = vmatpush.msra.mxu1 %v1638_v28  ;;  %882 = vmatpush.msra.mxu3 %v1704_v43 }
 0x26a   :  { %800 = vmatpush.msra.mxu1 %v1684_v39  ;;  %883 = vmatpush.msra.mxu3 %v1720_v46 }
 0x2d8   :  { %v576_v62 = vpop.f32.mrf.mxu1 }
 0x2d9   :  { %v599_v27 = vadd.f32 %v576_v62, %v1841_v7 }
 0x2db   :  { %v1316_v31 = vmul.f32 -1.442695, %v599_v27 }
 0x2de   :  { %v596_v18 = vpop.f32.mrf.mxu3 }
 0x2df   :  { %v600_v23 = vadd.f32 %v596_v18, %v398_v15 }
 0x2e1   :  { %1360 = vtanh.f32 %v600_v23  ;;  %v1317_v10 = vmul.f32 -1.442695, %v600_v23 }
 0x2e2   :  { %1362 = vpow2.f32 %v1316_v31 }
 0x2e7   :  { %v1361_v25 = vpop.eup %1360 }
 0x2e8   :  { %642 = vrot.lane.b32.xlu1 %v1361_v25, %s1500_s3  ;;  %v1363_v34 = vpop.eup %1362 }
 0x2e9   :  { %v607_v47 = vadd.f32 1.0, %v1363_v34 }
 0x2eb   :  { %1364 = vrcp.f32 %v607_v47  ;;  %v620_v41 = vand.u32 2147483648, %v607_v47  ;;  %vm614_vm12 = vweird.f32 %v607_v47  ;;  %v618_v54 = vand.u32 2147483647, %v607_v47 }
 0x2ed   :  { %v621_v60 = vor.u32 1.1754944e-38, %v620_v41  ;;  %vm619_vm14 = vcmp.eq.f32.partialorder %v618_v54, 8.507059e+37 }
 0x2f1   :  { %v1365_v9 = vpop.eup %1364 }
 0x2f2   :  { %v610_v53 = vmul.f32 %v1365_v9, %v607_v47  ;;  %vm615_vm11 = vweird.f32 %v1365_v9 }
 0x2f3   :  { %vm616_vm13 = vmor %vm614_vm12, %vm615_vm11 }
 0x2f4   :  { %v611_v55 = vsub.f32 1.0, %v610_v53 }
 0x2f6   :  { %v612_v11 = vmul.f32 %v1365_v9, %v611_v55 }
 0x2f8   :  { %v613_v13 = vadd.f32 %v1365_v9, %v612_v11 }
 0x2fa   :  { %v617_v59 = vsel %vm616_vm13, %v1365_v9, %v613_v13 }
 0x2fb   :  { %v622_v7 = vsel %vm619_vm14, %v621_v60, %v617_v59 }
 0x2fc   :  { %v640_v0 = vmul.f32 %v622_v7, %v1888_v44 }
 0x35a   :  { %v643_v61 = vpop.permute.xlu1 %642 }
 0x35b   :  { %v645_v50 = vmul.f32 %v643_v61, %v622_v7 }
 0x35d   :  { %647 = vrot.lane.b32.xlu2 %v645_v50, %s1500_s3 }
 0x3b7   :  { %v648_v3 = vpop.permute.xlu2 %647 }
 0x3b8   :  { %v1917_v57 = vadd.f32 %v648_v3, %v640_v0 }
 0x3ba   :  { %1366 = vtanh.f32 %v1917_v57 }
 0x3bb   :  { %1368 = vpow2.f32 %v1317_v10 }
 0x3c0   :  { %v1367_v6 = vpop.eup %1366 }
 0x3c1   :  { %653 = vrot.lane.b32.xlu2 %v1367_v6, %s1500_s3  ;;  %v1369_v12 = vpop.eup %1368 }
 0x3c2   :  { %v608_v37 = vadd.f32 1.0, %v1369_v12 }
 0x3c4   :  { %1370 = vrcp.f32 %v608_v37  ;;  %v635_v44 = vand.u32 2147483648, %v608_v37  ;;  %vm629_vm0 = vweird.f32 %v608_v37  ;;  %v633_v27 = vand.u32 2147483647, %v608_v37 }
 0x3c6   :  { %v636_v34 = vor.u32 1.1754944e-38, %v635_v44  ;;  %vm634_vm2 = vcmp.eq.f32.partialorder %v633_v27, 8.507059e+37 }
 0x3ca   :  { %v1371_v4 = vpop.eup %1370 }
 0x3cb   :  { %v625_v15 = vmul.f32 %v1371_v4, %v608_v37  ;;  %vm630_vm15 = vweird.f32 %v1371_v4 }
 0x3cc   :  { %vm631_vm1 = vmor %vm629_vm0, %vm630_vm15 }
 0x3cd   :  { %v626_v18 = vsub.f32 1.0, %v625_v15 }
 0x3cf   :  { %v627_v25 = vmul.f32 %v1371_v4, %v626_v18 }
 0x3d1   :  { %v628_v62 = vadd.f32 %v1371_v4, %v627_v25 }
 0x3d3   :  { %v632_v31 = vsel %vm631_vm1, %v1371_v4, %v628_v62 }
 0x3d4   :  { %v637_v47 = vsel %vm634_vm2, %v636_v34, %v632_v31 }
 0x41b   :  { %v654_v9 = vpop.permute.xlu2 %653 }
 0x41c   :  { %v656_v23 = vmul.f32 %v654_v9, %v637_v47 }
 0x41e   :  { %1318 = vmatmul.msk.f32.vlgmr.msrb.gmra.mxu1 %vm452_vm10, %v656_v23  ;;  %1319 = vmatmul.msk.f32.vlgmr.msrb.gmra.mxu3 %vm452_vm10, %v656_v23 }
 0x41f   :  { %999 = vmatpush.msrb.mxu1 %v1563_v1  ;;  %1082 = vmatpush.msrb.mxu3 %v1643_v29  ;;  %v360_v29 = vadd.f32 %v1865_v26, %v1847_v22 }
 0x421   :  { %1000 = vmatpush.msrb.mxu1 %v1575_v5  ;;  %1083 = vmatpush.msrb.mxu3 %v1648_v30  ;;  %v401_v30 = vadd.f32 %v1871_v45, %v360_v29 }
 0x423   :  { %1001 = vmatpush.msrb.mxu1 %v1581_v8  ;;  %1084 = vmatpush.msrb.mxu3 %v1658_v33 }
 0x425   :  { %1002 = vmatpush.msrb.mxu1 %v1598_v14  ;;  %1085 = vmatpush.msrb.mxu3 %v1672_v36 }
 0x427   :  { %1003 = vmatpush.msrb.mxu1 %v1609_v17  ;;  %1086 = vmatpush.msrb.mxu3 %v1689_v40 }
 0x429   :  { %1004 = vmatpush.msrb.mxu1 %v1615_v19  ;;  %1087 = vmatpush.msrb.mxu3 %v1695_v42 }
 0x42b   :  { %1005 = vmatpush.msrb.mxu1 %v1638_v28  ;;  %1088 = vmatpush.msrb.mxu3 %v1704_v43 }
 0x42d   :  { %1006 = vmatpush.msrb.mxu1 %v1684_v39  ;;  %1089 = vmatpush.msrb.mxu3 %v1720_v46 }
 0x49b   :  { %v679_v42 = vpop.f32.mrf.mxu1 }
 0x49c   :  { %v702_v53 = vadd.f32 %v679_v42, %v1845_v20 }
 0x49e   :  { %v1320_v55 = vmul.f32 -1.442695, %v702_v53 }
 0x4a1   :  { %v699_v33 = vpop.f32.mrf.mxu3 }
 0x4a2   :  { %v703_v36 = vadd.f32 %v699_v33, %v401_v30 }
 0x4a4   :  { %1372 = vtanh.f32 %v703_v36  ;;  %v1321_v10 = vmul.f32 -1.442695, %v703_v36 }
 0x4a5   :  { %1374 = vpow2.f32 %v1320_v55 }
 0x4aa   :  { %v1373_v40 = vpop.eup %1372 }
 0x4ab   :  { %745 = vrot.lane.b32.xlu0 %v1373_v40, %s1500_s3  ;;  %v1375_v43 = vpop.eup %1374 }
 0x4ac   :  { %v710_v11 = vadd.f32 1.0, %v1375_v43 }
 0x4ae   :  { %1376 = vrcp.f32 %v710_v11  ;;  %v723_v45 = vand.u32 2147483648, %v710_v11  ;;  %vm717_vm4 = vweird.f32 %v710_v11  ;;  %v721_v54 = vand.u32 2147483647, %v710_v11 }
 0x4b0   :  { %v724_v60 = vor.u32 1.1754944e-38, %v723_v45  ;;  %vm722_vm6 = vcmp.eq.f32.partialorder %v721_v54, 8.507059e+37 }
 0x4b4   :  { %v1377_v46 = vpop.eup %1376 }
 0x4b5   :  { %v713_v13 = vmul.f32 %v1377_v46, %v710_v11  ;;  %vm718_vm3 = vweird.f32 %v1377_v46 }
 0x4b6   :  { %vm719_vm5 = vmor %vm717_vm4, %vm718_vm3 }
 0x4b7   :  { %v714_v41 = vsub.f32 1.0, %v713_v13 }
 0x4b9   :  { %v715_v22 = vmul.f32 %v1377_v46, %v714_v41 }
 0x4bb   :  { %v716_v26 = vadd.f32 %v1377_v46, %v715_v22 }
 0x4bd   :  { %v720_v59 = vsel %vm719_vm5, %v1377_v46, %v716_v26 }
 0x4be   :  { %v725_v20 = vsel %vm722_vm6, %v724_v60, %v720_v59 }
 0x4bf   :  { %v743_v50 = vmul.f32 %v725_v20, %v1917_v57 }
 0x51d   :  { %v746_v61 = vpop.permute.xlu0 %745 }
 0x51e   :  { %v748_v7 = vmul.f32 %v746_v61, %v725_v20 }
 0x520   :  { %750 = vrot.lane.b32.xlu1 %v748_v7, %s1500_s3 }
 0x592   :  { %v751_v0 = vpop.permute.xlu1 %750 }
 0x593   :  { %v1946_v3 = vadd.f32 %v751_v0, %v743_v50 }
 0x595   :  { %1378 = vtanh.f32 %v1946_v3 }
 0x596   :  { %1380 = vpow2.f32 %v1321_v10 }
 0x59b   :  { %v1379_v6 = vpop.eup %1378 }
 0x59c   :  { %756 = vrot.lane.b32.xlu2 %v1379_v6, %s1500_s3  ;;  %v1381_v12 = vpop.eup %1380 }
 0x59d   :  { %v711_v37 = vadd.f32 1.0, %v1381_v12 }
 0x59f   :  { %1382 = vrcp.f32 %v711_v37  ;;  %v738_v57 = vand.u32 2147483648, %v711_v37  ;;  %vm732_vm8 = vweird.f32 %v711_v37  ;;  %v736_v44 = vand.u32 2147483647, %v711_v37 }
 0x5a1   :  { %v739_v31 = vor.u32 1.1754944e-38, %v738_v57  ;;  %vm737_vm11 = vcmp.eq.f32.partialorder %v736_v44, 8.507059e+37 }
 0x5a5   :  { %v1383_v4 = vpop.eup %1382 }
 0x5a6   :  { %v728_v15 = vmul.f32 %v1383_v4, %v711_v37  ;;  %vm733_vm7 = vweird.f32 %v1383_v4 }
 0x5a7   :  { %vm734_vm9 = vmor %vm732_vm8, %vm733_vm7 }
 0x5a8   :  { %v729_v18 = vsub.f32 1.0, %v728_v15 }
 0x5aa   :  { %v730_v25 = vmul.f32 %v1383_v4, %v729_v18 }
 0x5ac   :  { %v731_v62 = vadd.f32 %v1383_v4, %v730_v25 }
 0x5ae   :  { %v735_v27 = vsel %vm734_vm9, %v1383_v4, %v731_v62  ;;  %v407_v4 = vadd.f32 %v1880_v52, %v1874_v49 }
 0x5af   :  { %v740_v34 = vsel %vm737_vm11, %v739_v31, %v735_v27 }
 0x5f6   :  { %v757_v47 = vpop.permute.xlu2 %756 }
 0x5f7   :  { %v759_v9 = vmul.f32 %v757_v47, %v740_v34 }
 0x5f9   :  { %1322 = vmatmul.msk.f32.vlgmr.msra.gmra.mxu2 %vm452_vm10, %v759_v9  ;;  %1323 = vmatmul.msk.f32.vlgmr.msra.gmra.mxu1 %vm452_vm10, %v759_v9 }
 0x5fa   :  { %1102 = vmatpush.msra.mxu2 %v1563_v1  ;;  %1205 = vmatpush.msra.mxu1 %v1563_v1  ;;  %v363_v1 = vadd.f32 %v1869_v56, %v1851_v35 }
 0x5fc   :  { %1103 = vmatpush.msra.mxu2 %v1575_v5  ;;  %1206 = vmatpush.msra.mxu1 %v1575_v5  ;;  %v404_v5 = vadd.f32 %v1876_v63, %v363_v1 }
 0x5fe   :  { %1104 = vmatpush.msra.mxu2 %v1581_v8  ;;  %1207 = vmatpush.msra.mxu1 %v1581_v8 }
 0x600   :  { %1105 = vmatpush.msra.mxu2 %v1598_v14  ;;  %1208 = vmatpush.msra.mxu1 %v1598_v14 }
 0x602   :  { %1106 = vmatpush.msra.mxu2 %v1609_v17  ;;  %1209 = vmatpush.msra.mxu1 %v1609_v17 }
 0x604   :  { %1107 = vmatpush.msra.mxu2 %v1615_v19  ;;  %1210 = vmatpush.msra.mxu1 %v1615_v19  ;;  %v1972_v19 = vpop.f32.mrf.mxu2 }
 0x606   :  { %1108 = vmatpush.msra.mxu2 %v1638_v28  ;;  %1211 = vmatpush.msra.mxu1 %v1638_v28 }
 0x608   :  { %1109 = vmatpush.msra.mxu2 %v1684_v39  ;;  %1212 = vmatpush.msra.mxu1 %v1684_v39 }
 0x676   :  { %v802_v8 = vpop.f32.mrf.mxu1 }
 0x677   :  { %v806_v14 = vadd.f32 %v802_v8, %v404_v5 }
 0x679   :  { %1384 = vtanh.f32 %v806_v14  ;;  %v1325_v26 = vmul.f32 -1.442695, %v806_v14 }
 0x67c   :  { %v782_v23 = vpop.f32.mrf.mxu2 }
 0x67d   :  { %v805_v28 = vadd.f32 %v782_v23, %v1849_v32 }
 0x67f   :  { %v1385_v17 = vpop.eup %1384  ;;  %v1324_v29 = vmul.f32 -1.442695, %v805_v28 }
 0x680   :  { %848 = vrot.lane.b32.xlu0 %v1385_v17, %s1500_s3 }
 0x681   :  { %1386 = vpow2.f32 %v1324_v29 }
 0x687   :  { %v1387_v30 = vpop.eup %1386 }
 0x688   :  { %v813_v39 = vadd.f32 1.0, %v1387_v30 }
 0x68a   :  { %1388 = vrcp.f32 %v813_v39  ;;  %v826_v40 = vand.u32 2147483648, %v813_v39  ;;  %vm820_vm13 = vweird.f32 %v813_v39  ;;  %v824_v42 = vand.u32 2147483647, %v813_v39 }
 0x68c   :  { %v827_v55 = vor.u32 1.1754944e-38, %v826_v40  ;;  %vm825_vm15 = vcmp.eq.f32.partialorder %v824_v42, 8.507059e+37 }
 0x690   :  { %v1389_v33 = vpop.eup %1388 }
 0x691   :  { %v816_v35 = vmul.f32 %v1389_v33, %v813_v39  ;;  %vm821_vm12 = vweird.f32 %v1389_v33 }
 0x692   :  { %vm822_vm14 = vmor %vm820_vm13, %vm821_vm12 }
 0x693   :  { %v817_v56 = vsub.f32 1.0, %v816_v35 }
 0x695   :  { %v818_v63 = vmul.f32 %v1389_v33, %v817_v56 }
 0x697   :  { %v819_v36 = vadd.f32 %v1389_v33, %v818_v63 }
 0x699   :  { %v823_v53 = vsel %vm822_vm14, %v1389_v33, %v819_v36 }
 0x69a   :  { %v828_v32 = vsel %vm825_vm15, %v827_v55, %v823_v53 }
 0x69b   :  { %v846_v46 = vmul.f32 %v828_v32, %v1946_v3 }
 0x6f2   :  { %v849_v43 = vpop.permute.xlu0 %848 }
 0x6f3   :  { %v851_v11 = vmul.f32 %v849_v43, %v828_v32 }
 0x6f5   :  { %853 = vrot.lane.b32.xlu1 %v851_v11, %s1500_s3 }
 0x767   :  { %v854_v13 = vpop.permute.xlu1 %853 }
 0x768   :  { %v856_v41 = vadd.f32 %v854_v13, %v846_v46 }
 0x76a   :  { %1390 = vtanh.f32 %v856_v41 }
 0x76b   :  { %1392 = vpow2.f32 %v1325_v26 }
 0x770   :  { %v1391_v22 = vpop.eup %1390 }
 0x771   :  { %859 = vrot.lane.b32.xlu2 %v1391_v22, %s1500_s3  ;;  %v1393_v45 = vpop.eup %1392  ;;  %v410_v22 = vadd.f32 %v1882_v24, %v1878_v51 }
 0x772   :  { %v814_v54 = vadd.f32 1.0, %v1393_v45 }
 0x774   :  { %1394 = vrcp.f32 %v814_v54  ;;  %v841_v50 = vand.u32 2147483648, %v814_v54  ;;  %vm835_vm1 = vweird.f32 %v814_v54  ;;  %v839_v0 = vand.u32 2147483647, %v814_v54 }
 0x776   :  { %v842_v6 = vor.u32 1.1754944e-38, %v841_v50  ;;  %vm840_vm3 = vcmp.eq.f32.partialorder %v839_v0, 8.507059e+37 }
 0x77a   :  { %v1395_v59 = vpop.eup %1394 }
 0x77b   :  { %v831_v60 = vmul.f32 %v1395_v59, %v814_v54  ;;  %vm836_vm0 = vweird.f32 %v1395_v59 }
 0x77c   :  { %vm837_vm2 = vmor %vm835_vm1, %vm836_vm0 }
 0x77d   :  { %v832_v61 = vsub.f32 1.0, %v831_v60 }
 0x77f   :  { %v833_v20 = vmul.f32 %v1395_v59, %v832_v61 }
 0x781   :  { %v834_v7 = vadd.f32 %v1395_v59, %v833_v20 }
 0x783   :  { %v838_v3 = vsel %vm837_vm2, %v1395_v59, %v834_v7  ;;  %v1991_v59 = vpop.f32.mrf.mxu0 }
 0x784   :  { %v843_v10 = vsel %vm840_vm3, %v842_v6, %v838_v3 }
 0x7cb   :  { %v860_v12 = vpop.permute.xlu2 %859 }
 0x7cc   :  { %v862_v37 = vmul.f32 %v860_v12, %v843_v10 }
 0x7ce   :  { %1326 = vmatmul.msk.f32.vlgmr.msra.gmra.mxu3 %vm452_vm10, %v862_v37  ;;  %1327 = vmatmul.msk.f32.vlgmr.msrb.gmra.mxu2 %vm452_vm10, %v862_v37 }
 0x851   :  { %v905_v15 = vpop.f32.mrf.mxu2  ;;  %v885_v62 = vpop.f32.mrf.mxu3 }
 0x852   :  { %v909_v18 = vadd.f32 %v905_v15, %v407_v4  ;;  %v908_v57 = vadd.f32 %v885_v62, %v1853_v48 }
 0x854   :  { %1396 = vtanh.f32 %v909_v18  ;;  %v1328_v44 = vmul.f32 -1.442695, %v908_v57  ;;  %v1329_v33 = vmul.f32 -1.442695, %v909_v18 }
 0x856   :  { %1398 = vpow2.f32 %v1328_v44 }
 0x85a   :  { %v1397_v25 = vpop.eup %1396 }
 0x85b   :  { %951 = vrot.lane.b32.xlu0 %v1397_v25, %s1500_s3 }
 0x85c   :  { %v1399_v27 = vpop.eup %1398 }
 0x85d   :  { %v916_v31 = vadd.f32 1.0, %v1399_v27 }
 0x85f   :  { %1400 = vrcp.f32 %v916_v31  ;;  %v929_v49 = vand.u32 2147483648, %v916_v31  ;;  %vm923_vm5 = vweird.f32 %v916_v31  ;;  %v927_v52 = vand.u32 2147483647, %v916_v31 }
 0x861   :  { %v930_v14 = vor.u32 1.1754944e-38, %v929_v49  ;;  %vm928_vm7 = vcmp.eq.f32.partialorder %v927_v52, 8.507059e+37 }
 0x865   :  { %v1401_v34 = vpop.eup %1400 }
 0x866   :  { %v919_v47 = vmul.f32 %v1401_v34, %v916_v31  ;;  %vm924_vm4 = vweird.f32 %v1401_v34 }
 0x867   :  { %vm925_vm6 = vmor %vm923_vm5, %vm924_vm4 }
 0x868   :  { %v920_v9 = vsub.f32 1.0, %v919_v47 }
 0x86a   :  { %v921_v1 = vmul.f32 %v1401_v34, %v920_v9 }
 0x86c   :  { %v922_v5 = vadd.f32 %v1401_v34, %v921_v1 }
 0x86e   :  { %v926_v8 = vsel %vm925_vm6, %v1401_v34, %v922_v5 }
 0x86f   :  { %v931_v48 = vsel %vm928_vm7, %v930_v14, %v926_v8 }
 0x870   :  { %v949_v28 = vmul.f32 %v931_v48, %v856_v41 }
 0x8cd   :  { %v952_v17 = vpop.permute.xlu0 %951 }
 0x8ce   :  { %v954_v23 = vmul.f32 %v952_v17, %v931_v48 }
 0x8d0   :  { %956 = vrot.lane.b32.xlu1 %v954_v23, %s1500_s3 }
 0x942   :  { %v957_v29 = vpop.permute.xlu1 %956 }
 0x943   :  { %v959_v30 = vadd.f32 %v957_v29, %v949_v28 }
 0x945   :  { %1402 = vtanh.f32 %v959_v30 }
 0x946   :  { %1404 = vpow2.f32 %v1329_v33 }
 0x94b   :  { %v1403_v39 = vpop.eup %1402 }
 0x94c   :  { %962 = vrot.lane.b32.xlu2 %v1403_v39, %s1500_s3  ;;  %v1405_v35 = vpop.eup %1404 }
 0x94d   :  { %v917_v56 = vadd.f32 1.0, %v1405_v35 }
 0x94f   :  { %1406 = vrcp.f32 %v917_v56  ;;  %v944_v55 = vand.u32 2147483648, %v917_v56  ;;  %vm938_vm9 = vweird.f32 %v917_v56  ;;  %v942_v43 = vand.u32 2147483647, %v917_v56 }
 0x951   :  { %v945_v11 = vor.u32 1.1754944e-38, %v944_v55  ;;  %vm943_vm12 = vcmp.eq.f32.partialorder %v942_v43, 8.507059e+37 }
 0x955   :  { %v1407_v63 = vpop.eup %1406 }
 0x956   :  { %v934_v36 = vmul.f32 %v1407_v63, %v917_v56  ;;  %vm939_vm8 = vweird.f32 %v1407_v63 }
 0x957   :  { %vm940_vm11 = vmor %vm938_vm9, %vm939_vm8 }
 0x958   :  { %v935_v40 = vsub.f32 1.0, %v934_v36 }
 0x95a   :  { %v936_v42 = vmul.f32 %v1407_v63, %v935_v40 }
 0x95c   :  { %v937_v53 = vadd.f32 %v1407_v63, %v936_v42 }
 0x95e   :  { %v941_v32 = vsel %vm940_vm11, %v1407_v63, %v937_v53 }
 0x95f   :  { %v946_v46 = vsel %vm943_vm12, %v945_v11, %v941_v32 }
 0x9a6   :  { %v963_v13 = vpop.permute.xlu2 %962 }
 0x9a7   :  { %v965_v41 = vmul.f32 %v963_v13, %v946_v46 }
 0x9a9   :  { %1330 = vmatmul.msk.f32.vlgmr.msra.gmra.mxu0 %vm452_vm10, %v965_v41  ;;  %1331 = vmatmul.msk.f32.vlgmr.msrb.gmra.mxu1 %vm452_vm10, %v965_v41 }
 0xa26   :  { %v1008_v26 = vpop.f32.mrf.mxu1  ;;  %v988_v60 = vpop.f32.mrf.mxu0 }
 0xa27   :  { %v1012_v45 = vadd.f32 %v1008_v26, %v410_v22  ;;  %v1011_v61 = vadd.f32 %v988_v60, %v1855_v38 }
 0xa29   :  { %1408 = vtanh.f32 %v1012_v45  ;;  %v1332_v20 = vmul.f32 -1.442695, %v1011_v61  ;;  %v1333_v27 = vmul.f32 -1.442695, %v1012_v45 }
 0xa2b   :  { %1410 = vpow2.f32 %v1332_v20 }
 0xa2f   :  { %v1409_v54 = vpop.eup %1408 }
 0xa30   :  { %1054 = vrot.lane.b32.xlu0 %v1409_v54, %s1500_s3 }
 0xa31   :  { %v1411_v7 = vpop.eup %1410 }
 0xa32   :  { %v1019_v50 = vadd.f32 1.0, %v1411_v7 }
 0xa34   :  { %1412 = vrcp.f32 %v1019_v50  ;;  %v1032_v10 = vand.u32 2147483648, %v1019_v50  ;;  %vm1026_vm14 = vweird.f32 %v1019_v50  ;;  %v1030_v12 = vand.u32 2147483647, %v1019_v50 }
 0xa36   :  { %v1033_v4 = vor.u32 1.1754944e-38, %v1032_v10  ;;  %vm1031_vm0 = vcmp.eq.f32.partialorder %v1030_v12, 8.507059e+37 }
 0xa3a   :  { %v1413_v0 = vpop.eup %1412 }
 0xa3b   :  { %v1022_v3 = vmul.f32 %v1413_v0, %v1019_v50  ;;  %vm1027_vm13 = vweird.f32 %v1413_v0 }
 0xa3c   :  { %vm1028_vm15 = vmor %vm1026_vm14, %vm1027_vm13 }
 0xa3d   :  { %v1023_v6 = vsub.f32 1.0, %v1022_v3 }
 0xa3f   :  { %v1024_v51 = vmul.f32 %v1413_v0, %v1023_v6 }
 0xa41   :  { %v1025_v24 = vadd.f32 %v1413_v0, %v1024_v51 }
 0xa43   :  { %v1029_v37 = vsel %vm1028_vm15, %v1413_v0, %v1025_v24 }
 0xa44   :  { %v1034_v38 = vsel %vm1031_vm0, %v1033_v4, %v1029_v37 }
 0xa45   :  { %v1052_v25 = vmul.f32 %v1034_v38, %v959_v30 }
 0xaa2   :  { %v1055_v15 = vpop.permute.xlu0 %1054 }
 0xaa3   :  { %v1057_v18 = vmul.f32 %v1055_v15, %v1034_v38  ;;  %v375_v38 = vadd.f32 %v1972_v19, %v1863_v21 }
 0xaa5   :  { %1059 = vrot.lane.b32.xlu1 %v1057_v18, %s1500_s3  ;;  %v416_v18 = vadd.f32 %v1991_v59, %v375_v38 }
 0xb17   :  { %v1060_v62 = vpop.permute.xlu1 %1059 }
 0xb18   :  { %v1062_v57 = vadd.f32 %v1060_v62, %v1052_v25 }
 0xb1a   :  { %1414 = vtanh.f32 %v1062_v57 }
 0xb1b   :  { %1416 = vpow2.f32 %v1333_v27 }
 0xb20   :  { %v1415_v44 = vpop.eup %1414 }
 0xb21   :  { %1065 = vrot.lane.b32.xlu2 %v1415_v44, %s1500_s3  ;;  %v1417_v31 = vpop.eup %1416 }
 0xb22   :  { %v1020_v34 = vadd.f32 1.0, %v1417_v31 }
 0xb24   :  { %1418 = vrcp.f32 %v1020_v34  ;;  %v1047_v52 = vand.u32 2147483648, %v1020_v34  ;;  %vm1041_vm2 = vweird.f32 %v1020_v34  ;;  %v1045_v8 = vand.u32 2147483647, %v1020_v34 }
 0xb26   :  { %v1048_v17 = vor.u32 1.1754944e-38, %v1047_v52  ;;  %vm1046_vm4 = vcmp.eq.f32.partialorder %v1045_v8, 8.507059e+37 }
 0xb2a   :  { %v1419_v47 = vpop.eup %1418 }
 0xb2b   :  { %v1037_v9 = vmul.f32 %v1419_v47, %v1020_v34  ;;  %vm1042_vm1 = vweird.f32 %v1419_v47 }
 0xb2c   :  { %vm1043_vm3 = vmor %vm1041_vm2, %vm1042_vm1 }
 0xb2d   :  { %v1038_v1 = vsub.f32 1.0, %v1037_v9 }
 0xb2f   :  { %v1039_v5 = vmul.f32 %v1419_v47, %v1038_v1 }
 0xb31   :  { %v1040_v49 = vadd.f32 %v1419_v47, %v1039_v5 }
 0xb33   :  { %v1044_v14 = vsel %vm1043_vm3, %v1419_v47, %v1040_v49 }
 0xb34   :  { %v1049_v48 = vsel %vm1046_vm4, %v1048_v17, %v1044_v14 }
 0xb7b   :  { %v1066_v23 = vpop.permute.xlu2 %1065 }
 0xb7c   :  { %v1068_v28 = vmul.f32 %v1066_v23, %v1049_v48 }
 0xb7e   :  { %1334 = vmatmul.msk.f32.vlgmr.msrb.gmra.mxu3 %vm452_vm10, %v1068_v28  ;;  %1335 = vmatmul.msk.f32.vlgmr.msra.gmra.mxu2 %vm452_vm10, %v1068_v28 }
 0xc01   :  { %v1111_v29 = vpop.f32.mrf.mxu2  ;;  %v1091_v33 = vpop.f32.mrf.mxu3 }
 0xc02   :  { %v1115_v30 = vadd.f32 %v1111_v29, %v1884_v58  ;;  %v1114_v35 = vadd.f32 %v1091_v33, %v1857_v2 }
 0xc04   :  { %1420 = vtanh.f32 %v1115_v30  ;;  %v1336_v56 = vmul.f32 -1.442695, %v1114_v35  ;;  %v1337_v60 = vmul.f32 -1.442695, %v1115_v30 }
 0xc06   :  { %1422 = vpow2.f32 %v1336_v56 }
 0xc0a   :  { %v1421_v39 = vpop.eup %1420 }
 0xc0b   :  { %1157 = vrot.lane.b32.xlu0 %v1421_v39, %s1500_s3 }
 0xc0c   :  { %v1423_v63 = vpop.eup %1422 }
 0xc0d   :  { %v1122_v36 = vadd.f32 1.0, %v1423_v63 }
 0xc0f   :  { %1424 = vrcp.f32 %v1122_v36  ;;  %v1135_v32 = vand.u32 2147483648, %v1122_v36  ;;  %vm1129_vm6 = vweird.f32 %v1122_v36  ;;  %v1133_v58 = vand.u32 2147483647, %v1122_v36 }
 0xc11   :  { %v1136_v46 = vor.u32 1.1754944e-38, %v1135_v32  ;;  %vm1134_vm8 = vcmp.eq.f32.partialorder %v1133_v58, 8.507059e+37 }
 0xc15   :  { %v1425_v40 = vpop.eup %1424 }
 0xc16   :  { %v1125_v42 = vmul.f32 %v1425_v40, %v1122_v36  ;;  %vm1130_vm5 = vweird.f32 %v1425_v40 }
 0xc17   :  { %vm1131_vm7 = vmor %vm1129_vm6, %vm1130_vm5  ;;  %vm1275_vm5 = vcmask 517120  }
 0xc18   :  { %v1126_v53 = vsub.f32 1.0, %v1125_v42 }
 0xc1a   :  { %v1127_v55 = vmul.f32 %v1425_v40, %v1126_v53 }
 0xc1c   :  { %v1128_v43 = vadd.f32 %v1425_v40, %v1127_v55 }
 0xc1e   :  { %v1132_v11 = vsel %vm1131_vm7, %v1425_v40, %v1128_v43 }
 0xc1f   :  { %v1137_v2 = vsel %vm1134_vm8, %v1136_v46, %v1132_v11 }
 0xc20   :  { %v1155_v22 = vmul.f32 %v1137_v2, %v1062_v57 }
 0xc7d   :  { %v1158_v13 = vpop.permute.xlu0 %1157 }
 0xc7e   :  { %v1160_v41 = vmul.f32 %v1158_v13, %v1137_v2 }
 0xc80   :  { %1162 = vrot.lane.b32.xlu1 %v1160_v41, %s1500_s3 }
 0xcf2   :  { %v1163_v26 = vpop.permute.xlu1 %1162 }
 0xcf3   :  { %v1165_v45 = vadd.f32 %v1163_v26, %v1155_v22 }
 0xcf5   :  { %1426 = vtanh.f32 %v1165_v45 }
 0xcf6   :  { %1428 = vpow2.f32 %v1337_v60 }
 0xcfb   :  { %v1427_v54 = vpop.eup %1426 }
 0xcfc   :  { %1168 = vrot.lane.b32.xlu2 %v1427_v54, %s1500_s3  ;;  %v1429_v61 = vpop.eup %1428 }
 0xcfd   :  { %v1123_v20 = vadd.f32 1.0, %v1429_v61 }
 0xcff   :  { %1430 = vrcp.f32 %v1123_v20  ;;  %v1150_v51 = vand.u32 2147483648, %v1123_v20  ;;  %vm1144_vm11 = vweird.f32 %v1123_v20  ;;  %v1148_v24 = vand.u32 2147483647, %v1123_v20 }
 0xd01   :  { %v1151_v12 = vor.u32 1.1754944e-38, %v1150_v51  ;;  %vm1149_vm13 = vcmp.eq.f32.partialorder %v1148_v24, 8.507059e+37 }
 0xd05   :  { %v1431_v7 = vpop.eup %1430 }
 0xd06   :  { %v1140_v50 = vmul.f32 %v1431_v7, %v1123_v20  ;;  %vm1145_vm9 = vweird.f32 %v1431_v7 }
 0xd07   :  { %vm1146_vm12 = vmor %vm1144_vm11, %vm1145_vm9 }
 0xd08   :  { %v1141_v0 = vsub.f32 1.0, %v1140_v50 }
 0xd0a   :  { %v1142_v3 = vmul.f32 %v1431_v7, %v1141_v0 }
 0xd0c   :  { %v1143_v6 = vadd.f32 %v1431_v7, %v1142_v3 }
 0xd0e   :  { %v1147_v10 = vsel %vm1146_vm12, %v1431_v7, %v1143_v6 }
 0xd0f   :  { %v1152_v37 = vsel %vm1149_vm13, %v1151_v12, %v1147_v10 }
 0xd56   :  { %v1169_v4 = vpop.permute.xlu2 %1168 }
 0xd57   :  { %v1171_v15 = vmul.f32 %v1169_v4, %v1152_v37 }
 0xd59   :  { %1338 = vmatmul.msk.f32.vlgmr.msrb.gmra.mxu0 %vm452_vm10, %v1171_v15  ;;  %1339 = vmatmul.msk.f32.vlgmr.msra.gmra.mxu1 %vm452_vm10, %v1171_v15 }
 0xdd6   :  { %v1214_v25 = vpop.f32.mrf.mxu1  ;;  %v1194_v44 = vpop.f32.mrf.mxu0 }
 0xdd7   :  { %v1218_v62 = vadd.f32 %v1214_v25, %v416_v18  ;;  %v1217_v27 = vadd.f32 %v1194_v44, %v1861_v16 }
 0xdd9   :  { %1432 = vtanh.f32 %v1218_v62  ;;  %v1340_v31 = vmul.f32 -1.442695, %v1217_v27  ;;  %v1341_v30 = vmul.f32 -1.442695, %v1218_v62 }
 0xddb   :  { %1434 = vpow2.f32 %v1340_v31 }
 0xddf   :  { %v1433_v57 = vpop.eup %1432 }
 0xde0   :  { %1260 = vrot.lane.b32.xlu0 %v1433_v57, %s1500_s3 }
 0xde1   :  { %v1435_v34 = vpop.eup %1434 }
 0xde2   :  { %v1225_v47 = vadd.f32 1.0, %v1435_v34 }
 0xde4   :  { %1436 = vrcp.f32 %v1225_v47  ;;  %v1238_v59 = vand.u32 2147483648, %v1225_v47  ;;  %vm1232_vm14 = vweird.f32 %v1225_v47  ;;  %v1236_v49 = vand.u32 2147483647, %v1225_v47 }
 0xde6   :  { %v1239_v8 = vor.u32 1.1754944e-38, %v1238_v59  ;;  %vm1237_vm0 = vcmp.eq.f32.partialorder %v1236_v49, 8.507059e+37 }
 0xdea   :  { %v1437_v9 = vpop.eup %1436 }
 0xdeb   :  { %v1228_v1 = vmul.f32 %v1437_v9, %v1225_v47  ;;  %vm1233_vm10 = vweird.f32 %v1437_v9 }
 0xdec   :  { %vm1234_vm15 = vmor %vm1232_vm14, %vm1233_vm10 }
 0xded   :  { %v1229_v5 = vsub.f32 1.0, %v1228_v1 }
 0xdef   :  { %v1230_v21 = vmul.f32 %v1437_v9, %v1229_v5 }
 0xdf1   :  { %v1231_v19 = vadd.f32 %v1437_v9, %v1230_v21 }
 0xdf3   :  { %v1235_v52 = vsel %vm1234_vm15, %v1437_v9, %v1231_v19 }
 0xdf4   :  { %v1240_v16 = vsel %vm1237_vm0, %v1239_v8, %v1235_v52 }
 0xdf5   :  { %v1258_v48 = vmul.f32 %v1240_v16, %v1165_v45 }
 0xe52   :  { %v1261_v14 = vpop.permute.xlu0 %1260 }
 0xe53   :  { %v1263_v17 = vmul.f32 %v1261_v14, %v1240_v16 }
 0xe55   :  { %1265 = vrot.lane.b32.xlu1 %v1263_v17, %s1500_s3 }
 0xec7   :  { %v1266_v23 = vpop.permute.xlu1 %1265 }
 0xec8   :  { %v1268_v28 = vadd.f32 %v1266_v23, %v1258_v48 }
 0xeca   :  { %1438 = vtanh.f32 %v1268_v28 }
 0xecb   :  { %1440 = vpow2.f32 %v1341_v30 }
 0xed0   :  { %v1439_v29 = vpop.eup %1438 }
 0xed1   :  { %1271 = vrot.lane.b32.xlu2 %v1439_v29, %s1500_s3  ;;  %v1441_v39 = vpop.eup %1440 }
 0xed2   :  { %v1226_v33 = vadd.f32 1.0, %v1441_v39 }
 0xed4   :  { %1442 = vrcp.f32 %v1226_v33  ;;  %v1253_v42 = vand.u32 2147483648, %v1226_v33  ;;  %vm1247_vm2 = vweird.f32 %v1226_v33  ;;  %v1251_v53 = vand.u32 2147483647, %v1226_v33 }
 0xed6   :  { %v1254_v43 = vor.u32 1.1754944e-38, %v1253_v42  ;;  %vm1252_vm4 = vcmp.eq.f32.partialorder %v1251_v53, 8.507059e+37 }
 0xeda   :  { %v1443_v35 = vpop.eup %1442 }
 0xedb   :  { %v1243_v56 = vmul.f32 %v1443_v35, %v1226_v33  ;;  %vm1248_vm1 = vweird.f32 %v1443_v35 }
 0xedc   :  { %vm1249_vm3 = vmor %vm1247_vm2, %vm1248_vm1 }
 0xedd   :  { %v1244_v63 = vsub.f32 1.0, %v1243_v56 }
 0xedf   :  { %v1245_v36 = vmul.f32 %v1443_v35, %v1244_v63 }
 0xee1   :  { %v1246_v40 = vadd.f32 %v1443_v35, %v1245_v36 }
 0xee3   :  { %v1250_v55 = vsel %vm1249_vm3, %v1443_v35, %v1246_v40 }
 0xee4   :  { %v1255_v32 = vsel %vm1252_vm4, %v1254_v43, %v1250_v55 }
 0xf2b   :  { %v1272_v58 = vpop.permute.xlu2 %1271 }
 0xf2c   :  { %v1274_v11 = vmul.f32 %v1272_v58, %v1255_v32 }
 0xf2e   :  { %1276 = vst.msk [vmem:[#allocation6] sm:$0x3] %vm1275_vm5, %v1274_v11 }
 0xf2f   :  { %1287 = dma.vmem_to_hbm [thread:$0]  %s1283_s1, 32, %s1285_s24, [#allocation5]  }
 0xf30   :  { %1494 = dma.done.wait [#allocation5], 32  }
 0xf31   :  { %1495 = vsyncadd [#allocation5], 4294967264 }
 0xf32   :  { %1292 = vsyncpa [#allocation4], 1 }
 0xf33   :  { %1293 = vsyncpa [#allocation5], 1 }

</bundles_post_ra>
